<compile_context>
chip_gen: v7x
topology: tpu7x:2x2x1
jax: 0.10.0
libtpu: 0.0.40
codegen_flags: <defaults>
</compile_context>

<pallas_src>
import jax
import jax.numpy as jnp
from jax.experimental import pallas as pl
from jax.experimental.pallas import tpu as pltpu

EPS = 1e-5
NEG_SLOPE = 0.1


def _block2d_kernel(scale_ref, shift_ref, w_ref, x_ref, out_ref, pad_ref):
    # scale_ref, shift_ref: (1, Cin)        folded BatchNorm affine (eval mode)
    # w_ref:                (9, Cin, Cout)  conv taps, (kh, kw) row-major
    # x_ref:                (1, H, W, Cin)  one batch element, NHWC
    # out_ref:              (1, H, W, Cout)
    # pad_ref:              VMEM scratch (H + 2, W + 2, Cin)
    _, H, W, Cin = x_ref.shape
    Cout = out_ref.shape[3]

    # BatchNorm as per-channel affine (applied before zero-padding, like PyTorch).
    xb = x_ref[0] * scale_ref[...] + shift_ref[...]            # (H, W, Cin)

    # Zero-pad the normalized activations into VMEM scratch.
    pad_ref[...] = jnp.zeros_like(pad_ref)
    pad_ref[1:H + 1, 1:W + 1, :] = xb

    # 3x3 convolution = 9 shifted channel-contraction matmuls on the MXU.
    acc = jnp.zeros((H * W, Cout), dtype=jnp.float32)
    for kh in range(3):
        for kw in range(3):
            patch = pad_ref[kh:kh + H, kw:kw + W, :]           # (H, W, Cin)
            acc = acc + jnp.dot(
                patch.reshape(H * W, Cin),
                w_ref[kh * 3 + kw],                            # (Cin, Cout)
                preferred_element_type=jnp.float32,
            )

    # LeakyReLU(negative_slope=0.1), fused before the lane-dense store.
    y = jnp.where(acc > 0, acc, NEG_SLOPE * acc)
    out_ref[...] = y.reshape(1, H, W, Cout).astype(out_ref.dtype)


def block2d(x, weight, gamma, beta, running_mean, running_var, *, eps=EPS):
    """Fused BatchNorm2d(eval) -> Conv2d(3x3, pad=1, no bias) -> LeakyReLU(0.1).

    x:      (B, Cin, H, W) float32, NCHW (PyTorch layout)
    weight: (Cout, Cin, 3, 3) float32
    gamma, beta, running_mean, running_var: (Cin,) float32
    returns (B, Cout, H, W) float32
    """
    B, Cin, H, W = x.shape
    Cout, Cin_w, KH, KW = weight.shape
    assert (Cin_w, KH, KW) == (Cin, 3, 3)

    # Fold BN statistics into a per-channel affine (O(Cin) parameter-only work).
    scale = (gamma / jnp.sqrt(running_var + eps)).astype(jnp.float32)
    shift = (beta - running_mean * scale).astype(jnp.float32)

    # NCHW -> NHWC (channels on the lane axis); taps-major weight matrix.
    x_nhwc = jnp.transpose(x, (0, 2, 3, 1))
    w_taps = jnp.transpose(weight, (2, 3, 1, 0)).reshape(9, Cin, Cout)

    flops = 2 * B * H * W * 9 * Cin * Cout + 3 * B * H * W * Cin + 2 * B * H * W * Cout
    bytes_accessed = 4 * (B * H * W * Cin + B * H * W * Cout + 9 * Cin * Cout + 2 * Cin)

    out_nhwc = pl.pallas_call(
        _block2d_kernel,
        out_shape=jax.ShapeDtypeStruct((B, H, W, Cout), x.dtype),
        grid_spec=pltpu.PrefetchScalarGridSpec(
            num_scalar_prefetch=0,
            grid=(B,),
            in_specs=[
                pl.BlockSpec((1, Cin), lambda b: (0, 0)),             # BN scale (shared)
                pl.BlockSpec((1, Cin), lambda b: (0, 0)),             # BN shift (shared)
                pl.BlockSpec((9, Cin, Cout), lambda b: (0, 0, 0)),    # conv taps (shared)
                pl.BlockSpec((1, H, W, Cin), lambda b: (b, 0, 0, 0)),  # input image
            ],
            out_specs=pl.BlockSpec((1, H, W, Cout), lambda b: (b, 0, 0, 0)),
            scratch_shapes=[pltpu.VMEM((H + 2, W + 2, Cin), jnp.float32)],
        ),
        compiler_params=pltpu.CompilerParams(
            dimension_semantics=("parallel",),   # batch axis -> both TCs on v7x
        ),
        cost_estimate=pl.CostEstimate(
            flops=flops, transcendentals=0, bytes_accessed=bytes_accessed),
    )(scale.reshape(1, Cin), shift.reshape(1, Cin), w_taps, x_nhwc)

    return jnp.transpose(out_nhwc, (0, 3, 1, 2))


def block2d_ref(x, weight, gamma, beta, running_mean, running_var, eps=EPS):
    inv = gamma / jnp.sqrt(running_var + eps)
    xn = (x - running_mean[None, :, None, None]) * inv[None, :, None, None] \
         + beta[None, :, None, None]
    y = jax.lax.conv_general_dilated(
        xn, weight, window_strides=(1, 1), padding=((1, 1), (1, 1)),
        dimension_numbers=("NCHW", "OIHW", "NCHW"),
        precision=jax.lax.Precision.HIGHEST)
    return jnp.where(y > 0, y, NEG_SLOPE * y)


if __name__ == "__main__":
    B, Cin, Cout, H, W = 2, 4, 8, 16, 16
    key = jax.random.PRNGKey(0)
    kx, kw, kg, kb, km, kv = jax.random.split(key, 6)

    x = jax.random.normal(kx, (B, Cin, H, W), dtype=jnp.float32)
    weight = 0.1 * jax.random.normal(kw, (Cout, Cin, 3, 3), dtype=jnp.float32)
    gamma = 1.0 + 0.1 * jax.random.normal(kg, (Cin,), dtype=jnp.float32)
    beta = 0.1 * jax.random.normal(kb, (Cin,), dtype=jnp.float32)
    running_mean = 0.1 * jax.random.normal(km, (Cin,), dtype=jnp.float32)
    running_var = jax.random.uniform(kv, (Cin,), dtype=jnp.float32,
                                     minval=0.5, maxval=1.5)

    out = block2d(x, weight, gamma, beta, running_mean, running_var)
    out = jax.block_until_ready(out)

    ref = block2d_ref(x, weight, gamma, beta, running_mean, running_var)
    assert out.shape == (B, Cout, H, W)
    assert jnp.allclose(out, ref, atol=1e-4, rtol=1e-4), \
        float(jnp.max(jnp.abs(out - ref)))

    print("KERNEL_OK")
</pallas_src>

<mosaic_0001>
module attributes {stable_mosaic.version = 11 : i64} {
  func.func @_block2d_kernel(%arg0: i32, %arg1: memref<1x4xf32, #tpu.memory_space<vmem>>, %arg2: memref<1x4xf32, #tpu.memory_space<vmem>>, %arg3: memref<9x4x8xf32, #tpu.memory_space<vmem>>, %arg4: memref<1x16x16x4xf32, #tpu.memory_space<vmem>>, %arg5: memref<1x16x16x8xf32, #tpu.memory_space<vmem>>, %arg6: memref<18x18x4xf32, #tpu.memory_space<vmem>>) attributes {dimension_semantics = [#tpu.dimension_semantics<parallel>], iteration_bounds = array<i64: 2>, scalar_prefetch = 0 : i64, scratch_operands = 1 : i64, tpu.core_type = #tpu.core_type<tc>, window_params = [{pipeline_mode = #tpu.pipeline_mode<synchronous>, transform_indices = @transform_0, window_bounds = array<i64: 1, 4>}, {pipeline_mode = #tpu.pipeline_mode<synchronous>, transform_indices = @transform_1, window_bounds = array<i64: 1, 4>}, {pipeline_mode = #tpu.pipeline_mode<synchronous>, transform_indices = @transform_2, window_bounds = array<i64: 9, 4, 8>}, {transform_indices = @transform_3, window_bounds = array<i64: 1, 16, 16, 4>}, {transform_indices = @transform_4, window_bounds = array<i64: 1, 16, 16, 8>}]} {
    %c0 = arith.constant 0 : index
    %c0_0 = arith.constant 0 : index
    %c0_1 = arith.constant 0 : index
    %c0_2 = arith.constant 0 : index
    %0 = vector.load %arg4[%c0, %c0_0, %c0_1, %c0_2] : memref<1x16x16x4xf32, #tpu.memory_space<vmem>>, vector<1x16x16x4xf32>
    %1 = vector.shape_cast %0 : vector<1x16x16x4xf32> to vector<16x16x4xf32>
    %c0_3 = arith.constant 0 : index
    %c0_4 = arith.constant 0 : index
    %2 = vector.load %arg1[%c0_3, %c0_4] : memref<1x4xf32, #tpu.memory_space<vmem>>, vector<1x4xf32>
    %3 = vector.shape_cast %2 : vector<1x4xf32> to vector<1x1x4xf32>
    %4 = vector.broadcast %3 : vector<1x1x4xf32> to vector<16x16x4xf32>
    %5 = arith.mulf %1, %4 : vector<16x16x4xf32>
    %c0_5 = arith.constant 0 : index
    %c0_6 = arith.constant 0 : index
    %6 = vector.load %arg2[%c0_5, %c0_6] : memref<1x4xf32, #tpu.memory_space<vmem>>, vector<1x4xf32>
    %7 = vector.shape_cast %6 : vector<1x4xf32> to vector<1x1x4xf32>
    %8 = vector.broadcast %7 : vector<1x1x4xf32> to vector<16x16x4xf32>
    %9 = arith.addf %5, %8 : vector<16x16x4xf32>
    %cst = arith.constant 0.000000e+00 : f32
    %10 = vector.broadcast %cst : f32 to vector<18x18x4xf32>
    %c0_7 = arith.constant 0 : index
    %c0_8 = arith.constant 0 : index
    %c0_9 = arith.constant 0 : index
    %11 = vector.load %arg6[%c0_7, %c0_8, %c0_9] : memref<18x18x4xf32, #tpu.memory_space<vmem>>, vector<18x18x4xf32>
    tpu.vector_store %arg6[%c0_7, %c0_8, %c0_9], %10 {strides = array<i32>} : memref<18x18x4xf32, #tpu.memory_space<vmem>>, vector<18x18x4xf32>,
    %c1 = arith.constant 1 : index
    %c1_10 = arith.constant 1 : index
    %c0_11 = arith.constant 0 : index
    %12 = vector.load %arg6[%c1, %c1_10, %c0_11] : memref<18x18x4xf32, #tpu.memory_space<vmem>>, vector<16x16x4xf32>
    tpu.vector_store %arg6[%c1, %c1_10, %c0_11], %9 {strides = array<i32>} : memref<18x18x4xf32, #tpu.memory_space<vmem>>, vector<16x16x4xf32>,
    %cst_12 = arith.constant 0.000000e+00 : f32
    %13 = vector.broadcast %cst_12 : f32 to vector<256x8xf32>
    %c0_13 = arith.constant 0 : index
    %c0_14 = arith.constant 0 : index
    %c0_15 = arith.constant 0 : index
    %14 = vector.load %arg6[%c0_13, %c0_14, %c0_15] : memref<18x18x4xf32, #tpu.memory_space<vmem>>, vector<16x16x4xf32>
    %15 = vector.shape_cast %14 : vector<16x16x4xf32> to vector<256x4xf32>
    %c0_16 = arith.constant 0 : index
    %c0_17 = arith.constant 0 : index
    %c0_18 = arith.constant 0 : index
    %16 = vector.load %arg3[%c0_16, %c0_17, %c0_18] : memref<9x4x8xf32, #tpu.memory_space<vmem>>, vector<1x4x8xf32>
    %17 = vector.shape_cast %16 : vector<1x4x8xf32> to vector<4x8xf32>
    %cst_19 = arith.constant dense<0.000000e+00> : vector<256x8xf32>
    %18 = tpu.matmul %15, %17, %cst_19 {dimension_numbers = #tpu.dot_dimension_numbers<[1], [0], [0], [1], [0, 0, 1, 1], [], []>} : vector<256x4xf32>, vector<4x8xf32>, vector<256x8xf32> -> vector<256x8xf32>
    %19 = arith.addf %13, %18 : vector<256x8xf32>
    %c0_20 = arith.constant 0 : index
    %c1_21 = arith.constant 1 : index
    %c0_22 = arith.constant 0 : index
    %20 = vector.load %arg6[%c0_20, %c1_21, %c0_22] : memref<18x18x4xf32, #tpu.memory_space<vmem>>, vector<16x16x4xf32>
    %21 = vector.shape_cast %20 : vector<16x16x4xf32> to vector<256x4xf32>
    %c1_23 = arith.constant 1 : index
    %c0_24 = arith.constant 0 : index
    %c0_25 = arith.constant 0 : index
    %22 = vector.load %arg3[%c1_23, %c0_24, %c0_25] : memref<9x4x8xf32, #tpu.memory_space<vmem>>, vector<1x4x8xf32>
    %23 = vector.shape_cast %22 : vector<1x4x8xf32> to vector<4x8xf32>
    %cst_26 = arith.constant dense<0.000000e+00> : vector<256x8xf32>
    %24 = tpu.matmul %21, %23, %cst_26 {dimension_numbers = #tpu.dot_dimension_numbers<[1], [0], [0], [1], [0, 0, 1, 1], [], []>} : vector<256x4xf32>, vector<4x8xf32>, vector<256x8xf32> -> vector<256x8xf32>
    %25 = arith.addf %19, %24 : vector<256x8xf32>
    %c0_27 = arith.constant 0 : index
    %c2 = arith.constant 2 : index
    %c0_28 = arith.constant 0 : index
    %26 = vector.load %arg6[%c0_27, %c2, %c0_28] : memref<18x18x4xf32, #tpu.memory_space<vmem>>, vector<16x16x4xf32>
    %27 = vector.shape_cast %26 : vector<16x16x4xf32> to vector<256x4xf32>
    %c2_29 = arith.constant 2 : index
    %c0_30 = arith.constant 0 : index
    %c0_31 = arith.constant 0 : index
    %28 = vector.load %arg3[%c2_29, %c0_30, %c0_31] : memref<9x4x8xf32, #tpu.memory_space<vmem>>, vector<1x4x8xf32>
    %29 = vector.shape_cast %28 : vector<1x4x8xf32> to vector<4x8xf32>
    %cst_32 = arith.constant dense<0.000000e+00> : vector<256x8xf32>
    %30 = tpu.matmul %27, %29, %cst_32 {dimension_numbers = #tpu.dot_dimension_numbers<[1], [0], [0], [1], [0, 0, 1, 1], [], []>} : vector<256x4xf32>, vector<4x8xf32>, vector<256x8xf32> -> vector<256x8xf32>
    %31 = arith.addf %25, %30 : vector<256x8xf32>
    %c1_33 = arith.constant 1 : index
    %c0_34 = arith.constant 0 : index
    %c0_35 = arith.constant 0 : index
    %32 = vector.load %arg6[%c1_33, %c0_34, %c0_35] : memref<18x18x4xf32, #tpu.memory_space<vmem>>, vector<16x16x4xf32>
    %33 = vector.shape_cast %32 : vector<16x16x4xf32> to vector<256x4xf32>
    %c3 = arith.constant 3 : index
    %c0_36 = arith.constant 0 : index
    %c0_37 = arith.constant 0 : index
    %34 = vector.load %arg3[%c3, %c0_36, %c0_37] : memref<9x4x8xf32, #tpu.memory_space<vmem>>, vector<1x4x8xf32>
    %35 = vector.shape_cast %34 : vector<1x4x8xf32> to vector<4x8xf32>
    %cst_38 = arith.constant dense<0.000000e+00> : vector<256x8xf32>
    %36 = tpu.matmul %33, %35, %cst_38 {dimension_numbers = #tpu.dot_dimension_numbers<[1], [0], [0], [1], [0, 0, 1, 1], [], []>} : vector<256x4xf32>, vector<4x8xf32>, vector<256x8xf32> -> vector<256x8xf32>
    %37 = arith.addf %31, %36 : vector<256x8xf32>
    %c1_39 = arith.constant 1 : index
    %c1_40 = arith.constant 1 : index
    %c0_41 = arith.constant 0 : index
    %38 = vector.load %arg6[%c1_39, %c1_40, %c0_41] : memref<18x18x4xf32, #tpu.memory_space<vmem>>, vector<16x16x4xf32>
    %39 = vector.shape_cast %38 : vector<16x16x4xf32> to vector<256x4xf32>
    %c4 = arith.constant 4 : index
    %c0_42 = arith.constant 0 : index
    %c0_43 = arith.constant 0 : index
    %40 = vector.load %arg3[%c4, %c0_42, %c0_43] : memref<9x4x8xf32, #tpu.memory_space<vmem>>, vector<1x4x8xf32>
    %41 = vector.shape_cast %40 : vector<1x4x8xf32> to vector<4x8xf32>
    %cst_44 = arith.constant dense<0.000000e+00> : vector<256x8xf32>
    %42 = tpu.matmul %39, %41, %cst_44 {dimension_numbers = #tpu.dot_dimension_numbers<[1], [0], [0], [1], [0, 0, 1, 1], [], []>} : vector<256x4xf32>, vector<4x8xf32>, vector<256x8xf32> -> vector<256x8xf32>
    %43 = arith.addf %37, %42 : vector<256x8xf32>
    %c1_45 = arith.constant 1 : index
    %c2_46 = arith.constant 2 : index
    %c0_47 = arith.constant 0 : index
    %44 = vector.load %arg6[%c1_45, %c2_46, %c0_47] : memref<18x18x4xf32, #tpu.memory_space<vmem>>, vector<16x16x4xf32>
    %45 = vector.shape_cast %44 : vector<16x16x4xf32> to vector<256x4xf32>
    %c5 = arith.constant 5 : index
    %c0_48 = arith.constant 0 : index
    %c0_49 = arith.constant 0 : index
    %46 = vector.load %arg3[%c5, %c0_48, %c0_49] : memref<9x4x8xf32, #tpu.memory_space<vmem>>, vector<1x4x8xf32>
    %47 = vector.shape_cast %46 : vector<1x4x8xf32> to vector<4x8xf32>
    %cst_50 = arith.constant dense<0.000000e+00> : vector<256x8xf32>
    %48 = tpu.matmul %45, %47, %cst_50 {dimension_numbers = #tpu.dot_dimension_numbers<[1], [0], [0], [1], [0, 0, 1, 1], [], []>} : vector<256x4xf32>, vector<4x8xf32>, vector<256x8xf32> -> vector<256x8xf32>
    %49 = arith.addf %43, %48 : vector<256x8xf32>
    %c2_51 = arith.constant 2 : index
    %c0_52 = arith.constant 0 : index
    %c0_53 = arith.constant 0 : index
    %50 = vector.load %arg6[%c2_51, %c0_52, %c0_53] : memref<18x18x4xf32, #tpu.memory_space<vmem>>, vector<16x16x4xf32>
    %51 = vector.shape_cast %50 : vector<16x16x4xf32> to vector<256x4xf32>
    %c6 = arith.constant 6 : index
    %c0_54 = arith.constant 0 : index
    %c0_55 = arith.constant 0 : index
    %52 = vector.load %arg3[%c6, %c0_54, %c0_55] : memref<9x4x8xf32, #tpu.memory_space<vmem>>, vector<1x4x8xf32>
    %53 = vector.shape_cast %52 : vector<1x4x8xf32> to vector<4x8xf32>
    %cst_56 = arith.constant dense<0.000000e+00> : vector<256x8xf32>
    %54 = tpu.matmul %51, %53, %cst_56 {dimension_numbers = #tpu.dot_dimension_numbers<[1], [0], [0], [1], [0, 0, 1, 1], [], []>} : vector<256x4xf32>, vector<4x8xf32>, vector<256x8xf32> -> vector<256x8xf32>
    %55 = arith.addf %49, %54 : vector<256x8xf32>
    %c2_57 = arith.constant 2 : index
    %c1_58 = arith.constant 1 : index
    %c0_59 = arith.constant 0 : index
    %56 = vector.load %arg6[%c2_57, %c1_58, %c0_59] : memref<18x18x4xf32, #tpu.memory_space<vmem>>, vector<16x16x4xf32>
    %57 = vector.shape_cast %56 : vector<16x16x4xf32> to vector<256x4xf32>
    %c7 = arith.constant 7 : index
    %c0_60 = arith.constant 0 : index
    %c0_61 = arith.constant 0 : index
    %58 = vector.load %arg3[%c7, %c0_60, %c0_61] : memref<9x4x8xf32, #tpu.memory_space<vmem>>, vector<1x4x8xf32>
    %59 = vector.shape_cast %58 : vector<1x4x8xf32> to vector<4x8xf32>
    %cst_62 = arith.constant dense<0.000000e+00> : vector<256x8xf32>
    %60 = tpu.matmul %57, %59, %cst_62 {dimension_numbers = #tpu.dot_dimension_numbers<[1], [0], [0], [1], [0, 0, 1, 1], [], []>} : vector<256x4xf32>, vector<4x8xf32>, vector<256x8xf32> -> vector<256x8xf32>
    %61 = arith.addf %55, %60 : vector<256x8xf32>
    %c2_63 = arith.constant 2 : index
    %c2_64 = arith.constant 2 : index
    %c0_65 = arith.constant 0 : index
    %62 = vector.load %arg6[%c2_63, %c2_64, %c0_65] : memref<18x18x4xf32, #tpu.memory_space<vmem>>, vector<16x16x4xf32>
    %63 = vector.shape_cast %62 : vector<16x16x4xf32> to vector<256x4xf32>
    %c8 = arith.constant 8 : index
    %c0_66 = arith.constant 0 : index
    %c0_67 = arith.constant 0 : index
    %64 = vector.load %arg3[%c8, %c0_66, %c0_67] : memref<9x4x8xf32, #tpu.memory_space<vmem>>, vector<1x4x8xf32>
    %65 = vector.shape_cast %64 : vector<1x4x8xf32> to vector<4x8xf32>
    %cst_68 = arith.constant dense<0.000000e+00> : vector<256x8xf32>
    %66 = tpu.matmul %63, %65, %cst_68 {dimension_numbers = #tpu.dot_dimension_numbers<[1], [0], [0], [1], [0, 0, 1, 1], [], []>} : vector<256x4xf32>, vector<4x8xf32>, vector<256x8xf32> -> vector<256x8xf32>
    %67 = arith.addf %61, %66 : vector<256x8xf32>
    %cst_69 = arith.constant 0.000000e+00 : f32
    %68 = vector.broadcast %cst_69 : f32 to vector<256x8xf32>
    %69 = arith.cmpf ogt, %67, %68 : vector<256x8xf32>
    %cst_70 = arith.constant 1.000000e-01 : f32
    %70 = vector.broadcast %cst_70 : f32 to vector<256x8xf32>
    %71 = arith.mulf %70, %67 : vector<256x8xf32>
    %72 = arith.select %69, %67, %71 : vector<256x8xi1>, vector<256x8xf32>
    %73 = vector.shape_cast %72 : vector<256x8xf32> to vector<1x16x16x8xf32>
    %c0_71 = arith.constant 0 : index
    %c0_72 = arith.constant 0 : index
    %c0_73 = arith.constant 0 : index
    %c0_74 = arith.constant 0 : index
    %74 = vector.load %arg5[%c0_71, %c0_72, %c0_73, %c0_74] : memref<1x16x16x8xf32, #tpu.memory_space<vmem>>, vector<1x16x16x8xf32>
    tpu.vector_store %arg5[%c0_71, %c0_72, %c0_73, %c0_74], %73 {strides = array<i32>} : memref<1x16x16x8xf32, #tpu.memory_space<vmem>>, vector<1x16x16x8xf32>,
    return
  }
  func.func @transform_0(%arg0: i32) -> (i32, i32) {
    %c0_i32 = arith.constant 0 : i32
    %c0_i32_0 = arith.constant 0 : i32
    %c0_i32_1 = arith.constant 0 : i32
    return %c0_i32, %c0_i32_0 : i32, i32
  }
  func.func @transform_1(%arg0: i32) -> (i32, i32) {
    %c0_i32 = arith.constant 0 : i32
    %c0_i32_0 = arith.constant 0 : i32
    %c0_i32_1 = arith.constant 0 : i32
    return %c0_i32, %c0_i32_0 : i32, i32
  }
  func.func @transform_2(%arg0: i32) -> (i32, i32, i32) {
    %c0_i32 = arith.constant 0 : i32
    %c0_i32_0 = arith.constant 0 : i32
    %c0_i32_1 = arith.constant 0 : i32
    %c0_i32_2 = arith.constant 0 : i32
    return %c0_i32, %c0_i32_0, %c0_i32_1 : i32, i32, i32
  }
  func.func @transform_3(%arg0: i32) -> (i32, i32, i32, i32) {
    %c0_i32 = arith.constant 0 : i32
    %c0_i32_0 = arith.constant 0 : i32
    %c0_i32_1 = arith.constant 0 : i32
    %c0_i32_2 = arith.constant 0 : i32
    return %arg0, %c0_i32, %c0_i32_0, %c0_i32_1 : i32, i32, i32, i32
  }
  func.func @transform_4(%arg0: i32) -> (i32, i32, i32, i32) {
    %c0_i32 = arith.constant 0 : i32
    %c0_i32_0 = arith.constant 0 : i32
    %c0_i32_1 = arith.constant 0 : i32
    %c0_i32_2 = arith.constant 0 : i32
    return %arg0, %c0_i32, %c0_i32_0, %c0_i32_1 : i32, i32, i32, i32
  }
}

</mosaic_0001>

<bundles_post_ra>
// kernel: tpu_custom_call.1
= control target key start
LH: loop header
LB: loop body
LE: loop exit
PB: predicated region body
PF: predicated region fallthrough
CT: control target
= control target key end

     0   :  { %s5396_s15 = smov 0   ;;  %s6526_s0 = inlined_call_operand.vmem [shape: f32[1,4], index: 0, kind: input, shape index: {}]   ;;  %s6527_s1 = inlined_call_operand.vmem [shape: f32[1,4], index: 1, kind: input, shape index: {}]   ;;  %s6528_s2 = inlined_call_operand.vmem [shape: f32[9,4,8], index: 2, kind: input, shape index: {}]   ;;  %s6529_s3 = inlined_call_operand.vmem [shape: f32[2,16,16,4], index: 3, kind: input, shape index: {}]   ;;  %s6530_s4 = inlined_call_operand.vmem [shape: f32[2,16,16,8], index: 4, kind: output, shape index: {}]  }
   0x1 LB: > { %s4028_s16 = sadd.s32 4294967295, %s5368_s15   ;;  %p4032_p0 = scmp.ge.s32.totalorder %s5368_s15, 1  ;;  %s5368_s15 = sphi %s5396_s15, %s14_s15  }
   0x2   : > { %p162_p1 = scmp.lt.s32.totalorder %s5368_s15, 3 }
   0x4   : > { %p163_p2 = pnand %p4032_p0, %p162_p1 }
   0x6   : > { %166 = sbr.rel (%p163_p2) target bundleno = 553 (0x229), region = 36 }
   0xd   : > { %v4039_v0 = vld [vmem:[%s6528_s2 + $0x4] sm:$0xf]  ;;  %vm560_vm0 = vcmask 1043456   ;;  %vm308_vm1 = vcmask 31744   ;;  %vm311_vm2 = vcmask 25600   ;;  %v5370_v1 = vmov 0.0  }
   0xe   : > { %4645 = vmatprep.subr.msk.mxu1 %vm560_vm0, %v4039_v0  ;;  %309 = vst.msk [vmem:[#allocation2] sm:$0xff] %vm308_vm1, %v5370_v1  ;;  %310 = vst.msk [vmem:[#allocation2 + $0x8] sm:$0xff] %vm308_vm1, %v5370_v1  ;;  %v5465_v2 = vld [vmem:[%s6528_s2 + $0x10] sm:$0xf]  ;;  %p188_p3 = scmp.lt.s32.totalorder %s4028_s16, 1  ;;  %vm3940_vm4 = vcmask 64512  }
   0xf   : > { %313 = vst.msk [vmem:[#allocation2 + $0x18] sm:$0xff] %vm308_vm1, %v5370_v1  ;;  %314 = vst.msk [vmem:[#allocation2 + $0x20] sm:$0xff] %vm308_vm1, %v5370_v1  ;;  %4646 = vmatpush3.msk.msra.mxu1 %vm560_vm0, %v4039_v0  ;;  %4845 = vmatprep.subr.msk.mxu0 %vm560_vm0, %v5465_v2  ;;  %v429_v3 = vld [vmem:[%s6528_s2] sm:$0xf]  ;;  %v5478_v4 = vld [vmem:[%s6528_s2 + $0x14] sm:$0xf] }
  0x10   : > { %316 = vst.msk [vmem:[#allocation2 + $0x30] sm:$0xff] %vm308_vm1, %v5370_v1  ;;  %317 = vst.msk [vmem:[#allocation2 + $0x38] sm:$0xff] %vm308_vm1, %v5370_v1  ;;  %4846 = vmatpush3.msk.msra.mxu0 %vm560_vm0, %v5465_v2  ;;  %s6639_s16 = smov (!%p188_p3, %s4028_s16), 1  ;;  %4695 = vmatprep.subr.msk.mxu1 %vm560_vm0, %v429_v3  ;;  %v5493_v5 = vld [vmem:[%s6526_s0] ss:$0 sm:$0xff] }
  0x11   : > { %319 = vst.msk [vmem:[#allocation2 + $0x48] sm:$0xff] %vm308_vm1, %v5370_v1  ;;  %320 = vst.msk [vmem:[#allocation2 + $0x50] sm:$0xff] %vm308_vm1, %v5370_v1  ;;  %4895 = vmatprep.subr.msk.mxu0 %vm560_vm0, %v5478_v4  ;;  %s4346_s25 = sshll.u32 %s6639_s16, 8  ;;  %v5505_v6 = vld [vmem:[%s6527_s1] ss:$0 sm:$0xff] }
  0x12   : > { %322 = vst.msk [vmem:[#allocation2 + $0x60] sm:$0xff] %vm308_vm1, %v5370_v1  ;;  %323 = vst.msk [vmem:[#allocation2 + $0x68] sm:$0xff] %vm308_vm1, %v5370_v1  ;;  %s5500_s30 = scalar_lea.vmem %s6529_s3, %s4346_s25  ;;  %v5513_v10 = vld [vmem:[%s6528_s2 + $0x8] sm:$0xf]  ;;  %s6451_s21 = scalar_lea.vmem %s6530_s4, %s4346_s25 }
  0x13   : > { %325 = vst.msk [vmem:[#allocation2 + $0x78] sm:$0xff] %vm308_vm1, %v5370_v1  ;;  %326 = vst.msk [vmem:[#allocation2 + $0x80] sm:$0xff] %vm308_vm1, %v5370_v1  ;;  %v198_v7 = vld [vmem:[%s5500_s30] sm:$0xff]  ;;  %v199_v8 = vld [vmem:[%s5500_s30 + $0x8] sm:$0xff] }
  0x14   : > { %328 = vst.msk [vmem:[#allocation2 + $0x90] sm:$0xff] %vm308_vm1, %v5370_v1  ;;  %329 = vst.msk [vmem:[#allocation2 + $0x98] sm:$0xff] %vm308_vm1, %v5370_v1  ;;  %v200_v9 = vld [vmem:[%s5500_s30 + $0x10] sm:$0xff]  ;;  %v237_v13 = vmul.f32 %v5493_v5, %v198_v7  ;;  %v238_v14 = vmul.f32 %v5493_v5, %v199_v8  ;;  %v201_v16 = vld [vmem:[%s5500_s30 + $0x18] sm:$0xff] }
  0x15   : > { %331 = vst.msk [vmem:[#allocation2 + $0xa8] sm:$0xff] %vm308_vm1, %v5370_v1  ;;  %332 = vst.msk [vmem:[#allocation2 + $0xb0] sm:$0xff] %vm308_vm1, %v5370_v1  ;;  %v430_v11 = vld [vmem:[#allocation2 + $0x1] sm:$0xff]  ;;  %v239_v15 = vmul.f32 %v5493_v5, %v200_v9  ;;  %v240_v17 = vmul.f32 %v5493_v5, %v201_v16  ;;  %v204_v20 = vld [vmem:[%s5500_s30 + $0x30] sm:$0xff] }
  0x16   : > { %334 = vst.msk [vmem:[#allocation2 + $0xc0] sm:$0xff] %vm308_vm1, %v5370_v1  ;;  %335 = vst.msk [vmem:[#allocation2 + $0xc8] sm:$0xff] %vm308_vm1, %v5370_v1  ;;  %4647 = vmatprep.mubr.msk.f32.mxu1 %vm308_vm1, %v430_v11  ;;  %v202_v18 = vld [vmem:[%s5500_s30 + $0x20] sm:$0xff]  ;;  %v203_v19 = vld [vmem:[%s5500_s30 + $0x28] sm:$0xff]  ;;  %v276_v21 = vadd.f32 %v5505_v6, %v237_v13  ;;  %v277_v22 = vadd.f32 %v5505_v6, %v238_v14  ;;  %v243_v30 = vmul.f32 %v5493_v5, %v204_v20 }
  0x17   : > { %337 = vst.msk [vmem:[#allocation2 + $0xd8] sm:$0xff] %vm308_vm1, %v5370_v1  ;;  %338 = vst.msk [vmem:[#allocation2 + $0xe0] sm:$0xff] %vm308_vm1, %v5370_v1  ;;  %v278_v23 = vadd.f32 %v5505_v6, %v239_v15  ;;  %v241_v24 = vmul.f32 %v5493_v5, %v202_v18  ;;  %v205_v25 = vld [vmem:[%s5500_s30 + $0x38] sm:$0xff]  ;;  %v206_v26 = vld [vmem:[%s5500_s30 + $0x40] sm:$0xff]  ;;  %v279_v28 = vadd.f32 %v5505_v6, %v240_v17 }
  0x18   : > { %340 = vst.msk [vmem:[#allocation2 + $0xf0] sm:$0xff] %vm308_vm1, %v5370_v1  ;;  %341 = vst.msk [vmem:[#allocation2 + $0xf8] sm:$0xff] %vm308_vm1, %v5370_v1  ;;  %v207_v27 = vld [vmem:[%s5500_s30 + $0x48] sm:$0xff]  ;;  %v242_v29 = vmul.f32 %v5493_v5, %v203_v19  ;;  %v244_v31 = vmul.f32 %v5493_v5, %v205_v25  ;;  %v208_v32 = vld [vmem:[%s5500_s30 + $0x50] sm:$0xff]  ;;  %v245_v36 = vmul.f32 %v5493_v5, %v206_v26 }
  0x19   : > { %343 = vst.msk [vmem:[#allocation2 + $0x108] sm:$0xff] %vm308_vm1, %v5370_v1  ;;  %344 = vst.msk [vmem:[#allocation2 + $0x110] sm:$0xff] %vm308_vm1, %v5370_v1  ;;  %v209_v33 = vld [vmem:[%s5500_s30 + $0x58] sm:$0xff]  ;;  %v210_v34 = vld [vmem:[%s5500_s30 + $0x60] sm:$0xff]  ;;  %v280_v35 = vadd.f32 %v5505_v6, %v241_v24  ;;  %v246_v37 = vmul.f32 %v5493_v5, %v207_v27  ;;  %v247_v38 = vmul.f32 %v5493_v5, %v208_v32 }
  0x1a   : > { %346 = vst.msk [vmem:[#allocation2 + $0x120] sm:$0xff] %vm308_vm1, %v5370_v1  ;;  %347 = vst.msk [vmem:[#allocation2 + $0x128] sm:$0xff] %vm308_vm1, %v5370_v1  ;;  %v211_v39 = vld [vmem:[%s5500_s30 + $0x68] sm:$0xff]  ;;  %v212_v40 = vld [vmem:[%s5500_s30 + $0x70] sm:$0xff]  ;;  %v281_v42 = vadd.f32 %v5505_v6, %v242_v29  ;;  %v282_v43 = vadd.f32 %v5505_v6, %v243_v30  ;;  %v283_v44 = vadd.f32 %v5505_v6, %v244_v31 }
  0x1b   : > { %349 = vst.msk [vmem:[#allocation2 + $0x138] sm:$0xff] %vm308_vm1, %v5370_v1  ;;  %350 = vst.msk [vmem:[#allocation2 + $0x140] sm:$0xff] %vm308_vm1, %v5370_v1  ;;  %v213_v41 = vld [vmem:[%s5500_s30 + $0x78] sm:$0xff]  ;;  %v248_v45 = vmul.f32 %v5493_v5, %v209_v33  ;;  %v214_v46 = vld [vmem:[%s5500_s30 + $0x80] sm:$0xff]  ;;  %v284_v49 = vadd.f32 %v5505_v6, %v245_v36  ;;  %v285_v50 = vadd.f32 %v5505_v6, %v246_v37 }
  0x1c   : > { %352 = vst.msk [vmem:[#allocation2 + $0x150] sm:$0xff] %vm308_vm1, %v5370_v1  ;;  %353 = vst.msk [vmem:[#allocation2 + $0x158] sm:$0xff] %vm308_vm1, %v5370_v1  ;;  %v215_v47 = vld [vmem:[%s5500_s30 + $0x88] sm:$0xff]  ;;  %v216_v48 = vld [vmem:[%s5500_s30 + $0x90] sm:$0xff]  ;;  %v286_v51 = vadd.f32 %v5505_v6, %v247_v38  ;;  %v249_v52 = vmul.f32 %v5493_v5, %v210_v34  ;;  %v250_v55 = vmul.f32 %v5493_v5, %v211_v39 }
  0x1d   : > { %355 = vst.msk [vmem:[#allocation2 + $0x168] sm:$0xff] %vm308_vm1, %v5370_v1  ;;  %356 = vst.msk [vmem:[#allocation2 + $0x170] sm:$0xff] %vm308_vm1, %v5370_v1  ;;  %v217_v53 = vld [vmem:[%s5500_s30 + $0x98] sm:$0xff]  ;;  %v287_v54 = vadd.f32 %v5505_v6, %v248_v45  ;;  %v251_v56 = vmul.f32 %v5493_v5, %v212_v40  ;;  %v252_v57 = vmul.f32 %v5493_v5, %v213_v41  ;;  %v218_v58 = vld [vmem:[%s5500_s30 + $0xa0] sm:$0xff] }
  0x1e   : > { %358 = vst.msk [vmem:[#allocation2 + $0x180] sm:$0xff] %vm308_vm1, %v5370_v1  ;;  %359 = vst.msk [vmem:[#allocation2 + $0x188] sm:$0xff] %vm308_vm1, %v5370_v1  ;;  %v288_v59 = vadd.f32 %v5505_v6, %v249_v52  ;;  %v253_v60 = vmul.f32 %v5493_v5, %v214_v46  ;;  %v254_v61 = vmul.f32 %v5493_v5, %v215_v47  ;;  %v219_v63 = vld [vmem:[%s5500_s30 + $0xa8] sm:$0xff]  ;;  %v220_v0 = vld [vmem:[%s5500_s30 + $0xb0] sm:$0xff] }
  0x1f   : > { %361 = vst.msk [vmem:[#allocation2 + $0x198] sm:$0xff] %vm308_vm1, %v5370_v1  ;;  %362 = vst.msk [vmem:[#allocation2 + $0x1a0] sm:$0xff] %vm308_vm1, %v5370_v1  ;;  %v255_v62 = vmul.f32 %v5493_v5, %v216_v48  ;;  %v290_v7 = vadd.f32 %v5505_v6, %v251_v56  ;;  %v291_v8 = vadd.f32 %v5505_v6, %v252_v57  ;;  %v222_v11 = vld [vmem:[%s5500_s30 + $0xc0] sm:$0xff]  ;;  %v5596_v14 = vld [vmem:[%s6528_s2 + $0x18] sm:$0xf] }
  0x20   : > { %312 = vst.msk [vmem:[#allocation2 + $0x10] sm:$0x3] %vm311_vm2, %v5370_v1  ;;  %315 = vst.msk [vmem:[#allocation2 + $0x28] sm:$0x3] %vm311_vm2, %v5370_v1  ;;  %v256_v9 = vmul.f32 %v5493_v5, %v217_v53  ;;  %v292_v13 = vadd.f32 %v5505_v6, %v253_v60  ;;  %v293_v15 = vadd.f32 %v5505_v6, %v254_v61  ;;  %v224_v18 = vld [vmem:[%s5500_s30 + $0xd0] sm:$0xff]  ;;  %v225_v29 = vld [vmem:[%s5500_s30 + $0xd8] sm:$0xff] }
  0x21   : > { %318 = vst.msk [vmem:[#allocation2 + $0x40] sm:$0x3] %vm311_vm2, %v5370_v1  ;;  %321 = vst.msk [vmem:[#allocation2 + $0x58] sm:$0x3] %vm311_vm2, %v5370_v1  ;;  %v294_v16 = vadd.f32 %v5505_v6, %v255_v62  ;;  %v257_v17 = vmul.f32 %v5493_v5, %v218_v58  ;;  %v259_v24 = vmul.f32 %v5493_v5, %v220_v0  ;;  %v226_v30 = vld [vmem:[%s5500_s30 + $0xe0] sm:$0xff]  ;;  %v227_v31 = vld [vmem:[%s5500_s30 + $0xe8] sm:$0xff] }
  0x22   : > { %324 = vst.msk [vmem:[#allocation2 + $0x70] sm:$0x3] %vm311_vm2, %v5370_v1  ;;  %327 = vst.msk [vmem:[#allocation2 + $0x88] sm:$0x3] %vm311_vm2, %v5370_v1  ;;  %v261_v27 = vmul.f32 %v5493_v5, %v222_v11  ;;  %v229_v36 = vld [vmem:[%s5500_s30 + $0xf8] sm:$0xff]  ;;  %v263_v40 = vmul.f32 %v5493_v5, %v224_v18 }
  0x23   : > { %330 = vst.msk [vmem:[#allocation2 + $0xa0] sm:$0x3] %vm311_vm2, %v5370_v1  ;;  %333 = vst.msk [vmem:[#allocation2 + $0xb8] sm:$0x3] %vm311_vm2, %v5370_v1  ;;  %v296_v26 = vadd.f32 %v5505_v6, %v257_v17  ;;  %v298_v33 = vadd.f32 %v5505_v6, %v259_v24  ;;  %v268_v46 = vmul.f32 %v5493_v5, %v229_v36 }
  0x24   : > { %336 = vst.msk [vmem:[#allocation2 + $0xd0] sm:$0x3] %vm311_vm2, %v5370_v1  ;;  %339 = vst.msk [vmem:[#allocation2 + $0xe8] sm:$0x3] %vm311_vm2, %v5370_v1  ;;  %v300_v38 = vadd.f32 %v5505_v6, %v261_v27 }
  0x25   : > { %342 = vst.msk [vmem:[#allocation2 + $0x100] sm:$0x3] %vm311_vm2, %v5370_v1  ;;  %345 = vst.msk [vmem:[#allocation2 + $0x118] sm:$0x3] %vm311_vm2, %v5370_v1 }
  0x26   : > { %348 = vst.msk [vmem:[#allocation2 + $0x130] sm:$0x3] %vm311_vm2, %v5370_v1  ;;  %351 = vst.msk [vmem:[#allocation2 + $0x148] sm:$0x3] %vm311_vm2, %v5370_v1 }
  0x27   : > { %354 = vst.msk [vmem:[#allocation2 + $0x160] sm:$0x3] %vm311_vm2, %v5370_v1  ;;  %357 = vst.msk [vmem:[#allocation2 + $0x178] sm:$0x3] %vm311_vm2, %v5370_v1  ;;  %v431_v12 = vld [vmem:[#allocation2 + $0x9] sm:$0xff] }
  0x28   : > { %360 = vst.msk [vmem:[#allocation2 + $0x190] sm:$0x3] %vm311_vm2, %v5370_v1  ;;  %363 = vst.msk [vmem:[#allocation2 + $0x1a8] sm:$0x3] %vm311_vm2, %v5370_v1  ;;  %4648 = vmatmul.mubr.msk.f32.vlgmr.msra.gmra.mrb[0].mxu1 %vm308_vm1, %v431_v12  ;;  %v221_v1 = vld [vmem:[%s5500_s30 + $0xb8] sm:$0xff]  ;;  %v223_v12 = vld [vmem:[%s5500_s30 + $0xc8] sm:$0xff] }
  0x29   : > { %4696 = vmatpush3.msk.msra.mxu1 %vm560_vm0, %v429_v3  ;;  %365 = vst.msk [vmem:[#allocation2 + $0x19] sm:$0xff] %vm308_vm1, %v276_v21  ;;  %366 = vst.msk [vmem:[#allocation2 + $0x21] sm:$0xff] %vm308_vm1, %v277_v22  ;;  %v289_v3 = vadd.f32 %v5505_v6, %v250_v55  ;;  %v295_v22 = vadd.f32 %v5505_v6, %v256_v9  ;;  %v260_v25 = vmul.f32 %v5493_v5, %v221_v1 }
  0x2a   : > { %367 = vst.msk [vmem:[#allocation2 + $0x31] sm:$0xff] %vm308_vm1, %v278_v23  ;;  %4745 = vmatprep.subr.msk.mxu1 %vm560_vm0, %v5513_v10  ;;  %368 = vst.msk [vmem:[#allocation2 + $0x39] sm:$0xff] %vm308_vm1, %v279_v28  ;;  %v258_v23 = vmul.f32 %v5493_v5, %v219_v63  ;;  %v262_v28 = vmul.f32 %v5493_v5, %v223_v12 }
  0x2b   : > { %369 = vst.msk [vmem:[#allocation2 + $0x49] sm:$0xff] %vm308_vm1, %v280_v35  ;;  %370 = vst.msk [vmem:[#allocation2 + $0x51] sm:$0xff] %vm308_vm1, %v281_v42  ;;  %v299_v34 = vadd.f32 %v5505_v6, %v260_v25  ;;  %v228_v35 = vld [vmem:[%s5500_s30 + $0xf0] sm:$0xff]  ;;  %v265_v42 = vmul.f32 %v5493_v5, %v226_v30 }
  0x2c   : > { %371 = vst.msk [vmem:[#allocation2 + $0x61] sm:$0xff] %vm308_vm1, %v282_v43  ;;  %372 = vst.msk [vmem:[#allocation2 + $0x69] sm:$0xff] %vm308_vm1, %v283_v44  ;;  %v297_v32 = vadd.f32 %v5505_v6, %v258_v23  ;;  %v301_v39 = vadd.f32 %v5505_v6, %v262_v28  ;;  %v266_v43 = vmul.f32 %v5493_v5, %v227_v31 }
  0x2d   : > { %373 = vst.msk [vmem:[#allocation2 + $0x79] sm:$0xff] %vm308_vm1, %v284_v49  ;;  %374 = vst.msk [vmem:[#allocation2 + $0x81] sm:$0xff] %vm308_vm1, %v285_v50  ;;  %v302_v44 = vadd.f32 %v5505_v6, %v263_v40  ;;  %v267_v45 = vmul.f32 %v5493_v5, %v228_v35  ;;  %v304_v48 = vadd.f32 %v5505_v6, %v265_v42 }
  0x2e   : > { %375 = vst.msk [vmem:[#allocation2 + $0x91] sm:$0xff] %vm308_vm1, %v286_v51  ;;  %376 = vst.msk [vmem:[#allocation2 + $0x99] sm:$0xff] %vm308_vm1, %v287_v54  ;;  %v305_v49 = vadd.f32 %v5505_v6, %v266_v43  ;;  %v307_v51 = vadd.f32 %v5505_v6, %v268_v46 }
  0x2f   : > { %377 = vst.msk [vmem:[#allocation2 + $0xa9] sm:$0xff] %vm308_vm1, %v288_v59  ;;  %378 = vst.msk [vmem:[#allocation2 + $0xb1] sm:$0xff] %vm308_vm1, %v289_v3 }
  0x30   : > { %v432_v19 = vld [vmem:[#allocation2 + $0x19] sm:$0xff]  ;;  %v433_v20 = vld [vmem:[#allocation2 + $0x21] sm:$0xff]  ;;  %379 = vst.msk [vmem:[#allocation2 + $0xc1] sm:$0xff] %vm308_vm1, %v290_v7  ;;  %380 = vst.msk [vmem:[#allocation2 + $0xc9] sm:$0xff] %vm308_vm1, %v291_v8 }
  0x31   : > { %v5602_v21 = vld [vmem:[#allocation2 + $0x31] sm:$0xff]  ;;  %4650 = vmatprep.mubr.msk.f32.mxu1 %vm308_vm1, %v432_v19  ;;  %4847 = vmatprep.mubr.msk.f32.mxu0 %vm308_vm1, %v432_v19  ;;  %381 = vst.msk [vmem:[#allocation2 + $0xd9] sm:$0xff] %vm308_vm1, %v292_v13  ;;  %382 = vst.msk [vmem:[#allocation2 + $0xe1] sm:$0xff] %vm308_vm1, %v293_v15  ;;  %v5634_v37 = vld [vmem:[#allocation2 + $0x39] sm:$0xff] }
  0x32   : > { %383 = vst.msk [vmem:[#allocation2 + $0xf1] sm:$0xff] %vm308_vm1, %v294_v16  ;;  %4651 = vmatmul.mubr.msk.f32.gmra.mrb[2].mxu1 %vm308_vm1, %v433_v20  ;;  %4848 = vmatmul.mubr.msk.f32.vlgmr.msra.gmra.mrb[0].mxu0 %vm308_vm1, %v433_v20  ;;  %384 = vst.msk [vmem:[#allocation2 + $0xf9] sm:$0xff] %vm308_vm1, %v295_v22  ;;  %v5642_v41 = vld [vmem:[#allocation2 + $0x49] sm:$0xff]  ;;  %v5668_v50 = vld [vmem:[#allocation2 + $0x51] sm:$0xff] }
  0x33   : > { %4896 = vmatpush3.msk.msra.mxu0 %vm560_vm0, %v5478_v4  ;;  %4653 = vmatprep.mubr.msk.f32.mxu1 %vm308_vm1, %v5602_v21  ;;  %385 = vst.msk [vmem:[#allocation2 + $0x109] sm:$0xff] %vm308_vm1, %v296_v26  ;;  %386 = vst.msk [vmem:[#allocation2 + $0x111] sm:$0xff] %vm308_vm1, %v297_v32  ;;  %v264_v4 = vmul.f32 %v5493_v5, %v225_v29  ;;  %v306_v5 = vadd.f32 %v5505_v6, %v267_v45  ;;  %v5673_v52 = vld [vmem:[#allocation2 + $0x61] sm:$0xff]  ;;  %v5756_v3 = vld [vmem:[#allocation2 + $0x32] sm:$0xff] }
  0x34   : > { %4850 = vmatprep.mubr.msk.f32.mxu0 %vm308_vm1, %v5602_v21  ;;  %4945 = vmatprep.subr.msk.mxu0 %vm560_vm0, %v5596_v14  ;;  %387 = vst.msk [vmem:[#allocation2 + $0x121] sm:$0xff] %vm308_vm1, %v298_v33  ;;  %388 = vst.msk [vmem:[#allocation2 + $0x129] sm:$0xff] %vm308_vm1, %v299_v34  ;;  %v5690_v53 = vld [vmem:[#allocation2 + $0x79] sm:$0xff]  ;;  %v5700_v54 = vld [vmem:[#allocation2 + $0x81] sm:$0xff] }
  0x35   : > { %389 = vst.msk [vmem:[#allocation2 + $0x139] sm:$0xff] %vm308_vm1, %v300_v38  ;;  %390 = vst.msk [vmem:[#allocation2 + $0x141] sm:$0xff] %vm308_vm1, %v301_v39  ;;  %v303_v47 = vadd.f32 %v5505_v6, %v264_v4  ;;  %v5688_v6 = vld [vmem:[#allocation2 + $0x69] sm:$0xff]  ;;  %v5702_v55 = vld [vmem:[#allocation2 + $0x91] sm:$0xff] }
  0x36   : > { %4654 = vmatmul.mubr.msk.f32.gmra.mrb[4].mxu1 %vm308_vm1, %v5634_v37  ;;  %4851 = vmatmul.mubr.msk.f32.gmra.mrb[2].mxu0 %vm308_vm1, %v5634_v37  ;;  %391 = vst.msk [vmem:[#allocation2 + $0x151] sm:$0xff] %vm308_vm1, %v302_v44  ;;  %393 = vst.msk [vmem:[#allocation2 + $0x169] sm:$0xff] %vm308_vm1, %v304_v48  ;;  %v5712_v56 = vld [vmem:[#allocation2 + $0x99] sm:$0xff]  ;;  %v5714_v57 = vld [vmem:[#allocation2 + $0xa9] sm:$0xff] }
  0x37   : > { %4656 = vmatprep.mubr.msk.f32.mxu1 %vm308_vm1, %v5642_v41  ;;  %4853 = vmatprep.mubr.msk.f32.mxu0 %vm308_vm1, %v5642_v41  ;;  %392 = vst.msk [vmem:[#allocation2 + $0x159] sm:$0xff] %vm308_vm1, %v303_v47  ;;  %394 = vst.msk [vmem:[#allocation2 + $0x171] sm:$0xff] %vm308_vm1, %v305_v49  ;;  %v5724_v58 = vld [vmem:[#allocation2 + $0xb1] sm:$0xff]  ;;  %v5726_v59 = vld [vmem:[#allocation2 + $0xc1] sm:$0xff] }
  0x38   : > { %395 = vst.msk [vmem:[#allocation2 + $0x181] sm:$0xff] %vm308_vm1, %v306_v5  ;;  %396 = vst.msk [vmem:[#allocation2 + $0x189] sm:$0xff] %vm308_vm1, %v307_v51  ;;  %v5736_v60 = vld [vmem:[#allocation2 + $0xc9] sm:$0xff]  ;;  %v5738_v61 = vld [vmem:[#allocation2 + $0xd9] sm:$0xff] }
  0x39   : > { %6576 = vst [vmem:[#allocation3_spill] sm:$0xff] %v5736_v60  ;;  %6577 = vst [vmem:[#allocation4_spill] sm:$0xff] %v5738_v61  ;;  %v5740_v62 = vld [vmem:[#allocation2 + $0x1a] sm:$0xff]  ;;  %v5752_v0 = vld [vmem:[#allocation2 + $0x22] sm:$0xff] }
  0x3a   : > { %4657 = vmatmul.mubr.msk.f32.gmra.mrb[6].mxu1 %vm308_vm1, %v5668_v50  ;;  %4854 = vmatmul.mubr.msk.f32.gmra.mrb[4].mxu0 %vm308_vm1, %v5668_v50  ;;  %v5750_v63 = vld [vmem:[#allocation2 + $0xe1] sm:$0xff]  ;;  %v5754_v1 = vld [vmem:[#allocation2 + $0xf1] sm:$0xff]  ;;  %v5761_v7 = vld [vmem:[%s6528_s2 + $0x1c] sm:$0xf] }
  0x3b   : > { %4659 = vmatprep.mubr.msk.f32.mxu1 %vm308_vm1, %v5673_v52  ;;  %4856 = vmatprep.mubr.msk.f32.mxu0 %vm308_vm1, %v5673_v52  ;;  %6578 = vst [vmem:[#allocation5_spill] sm:$0xff] %v5750_v63  ;;  %6579 = vst [vmem:[#allocation6_spill] sm:$0xff] %v5754_v1  ;;  %v5771_v8 = vld [vmem:[#allocation2 + $0xf9] sm:$0xff]  ;;  %v5777_v11 = vld [vmem:[#allocation2 + $0x109] sm:$0xff] }
  0x3c   : > { %6580 = vst [vmem:[#allocation7_spill] sm:$0xff] %v5771_v8  ;;  %v5773_v9 = vld [vmem:[#allocation2 + $0x3a] sm:$0xff]  ;;  %6581 = vst [vmem:[#allocation8_spill] sm:$0xff] %v5777_v11  ;;  %v5779_v12 = vld [vmem:[#allocation2 + $0x4a] sm:$0xff] }
  0x3d   : > { %v5791_v13 = vld [vmem:[#allocation2 + $0x111] sm:$0xff]  ;;  %v5795_v15 = vld [vmem:[#allocation2 + $0x121] sm:$0xff]  ;;  %v5807_v17 = vld [vmem:[#allocation2 + $0x129] sm:$0xff] }
  0x3e   : > { %4660 = vmatmul.mubr.msk.f32.gmra.mrb[8].mxu1 %vm308_vm1, %v5688_v6  ;;  %4857 = vmatmul.mubr.msk.f32.gmra.mrb[6].mxu0 %vm308_vm1, %v5688_v6  ;;  %6582 = vst [vmem:[#allocation9_spill] sm:$0xff] %v5791_v13  ;;  %6583 = vst [vmem:[#allocation10_spill] sm:$0xff] %v5795_v15  ;;  %v5797_v16 = vld [vmem:[#allocation2 + $0x62] sm:$0xff]  ;;  %v5809_v18 = vld [vmem:[#allocation2 + $0x6a] sm:$0xff] }
  0x3f   : > { %4662 = vmatprep.mubr.msk.f32.mxu1 %vm308_vm1, %v5690_v53  ;;  %4859 = vmatprep.mubr.msk.f32.mxu0 %vm308_vm1, %v5690_v53  ;;  %6584 = vst [vmem:[#allocation11_spill] sm:$0xff] %v5807_v17  ;;  %v5811_v19 = vld [vmem:[#allocation2 + $0x139] sm:$0xff]  ;;  %v5823_v22 = vld [vmem:[#allocation2 + $0x141] sm:$0xff]  ;;  %v5827_v24 = vld [vmem:[#allocation2 + $0x151] sm:$0xff] }
  0x40   : > { %6585 = vst [vmem:[#allocation12_spill] sm:$0xff] %v5811_v19  ;;  %v5813_v20 = vld [vmem:[#allocation2 + $0x7a] sm:$0xff]  ;;  %6586 = vst [vmem:[#allocation13_spill] sm:$0xff] %v5823_v22  ;;  %v5825_v23 = vld [vmem:[#allocation2 + $0x82] sm:$0xff] }
  0x41   : > { %6587 = vst [vmem:[#allocation14_spill] sm:$0xff] %v5827_v24  ;;  %v5829_v25 = vld [vmem:[#allocation2 + $0x92] sm:$0xff]  ;;  %v5841_v27 = vld [vmem:[#allocation2 + $0x9a] sm:$0xff]  ;;  %v5843_v28 = vld [vmem:[#allocation2 + $0x169] sm:$0xff] }
  0x42   : > { %4663 = vmatmul.mubr.msk.f32.gmra.mrb[10].mxu1 %vm308_vm1, %v5700_v54  ;;  %4860 = vmatmul.mubr.msk.f32.gmra.mrb[8].mxu0 %vm308_vm1, %v5700_v54  ;;  %v5839_v26 = vld [vmem:[#allocation2 + $0x159] sm:$0xff]  ;;  %6589 = vst [vmem:[#allocation16_spill] sm:$0xff] %v5843_v28  ;;  %v5845_v29 = vld [vmem:[#allocation2 + $0xaa] sm:$0xff]  ;;  %v5859_v33 = vld [vmem:[#allocation2 + $0xc2] sm:$0xff] }
  0x43   : > { %4665 = vmatprep.mubr.msk.f32.mxu1 %vm308_vm1, %v5702_v55  ;;  %4862 = vmatprep.mubr.msk.f32.mxu0 %vm308_vm1, %v5702_v55  ;;  %6588 = vst [vmem:[#allocation15_spill] sm:$0xff] %v5839_v26  ;;  %v5855_v30 = vld [vmem:[#allocation2 + $0x171] sm:$0xff]  ;;  %v397_v32 = vld [vmem:[#allocation2] sm:$0xff]  ;;  %v398_v34 = vld [vmem:[#allocation2 + $0x8] sm:$0xff] }
  0x44   : > { %6590 = vst [vmem:[#allocation17_spill] sm:$0xff] %v5855_v30  ;;  %v5857_v31 = vld [vmem:[#allocation2 + $0xb2] sm:$0xff]  ;;  %v5868_v35 = vld [vmem:[#allocation2 + $0xca] sm:$0xff]  ;;  %v5872_v38 = vld [vmem:[#allocation2 + $0xda] sm:$0xff] }
  0x45   : > { %v5870_v36 = vld [vmem:[#allocation2 + $0x18] sm:$0xff]  ;;  %v5880_v39 = vld [vmem:[%s6528_s2 + $0xc] sm:$0xf]  ;;  %v5886_v40 = vld [vmem:[#allocation2 + $0x20] sm:$0xff] }
  0x46   : > { %4666 = vmatmul.mubr.msk.f32.gmra.mrb[12].mxu1 %vm308_vm1, %v5712_v56  ;;  %4863 = vmatmul.mubr.msk.f32.gmra.mrb[10].mxu0 %vm308_vm1, %v5712_v56  ;;  %6591 = vst [vmem:[#allocation18_spill] sm:$0xff] %v5870_v36  ;;  %6592 = vst [vmem:[#allocation19_spill] sm:$0xff] %v5886_v40  ;;  %v5888_v4 = vld [vmem:[#allocation2 + $0xe2] sm:$0xff]  ;;  %v5892_v42 = vld [vmem:[#allocation2 + $0x30] sm:$0xff] }
  0x47   : > { %4668 = vmatprep.mubr.msk.f32.mxu1 %vm308_vm1, %v5714_v57  ;;  %4865 = vmatprep.mubr.msk.f32.mxu0 %vm308_vm1, %v5714_v57  ;;  %6593 = vst [vmem:[#allocation20_spill] sm:$0xff] %v5892_v42  ;;  %v5894_v43 = vld [vmem:[#allocation2 + $0xf2] sm:$0xff]  ;;  %v5908_v44 = vld [vmem:[#allocation2 + $0xfa] sm:$0xff]  ;;  %v5910_v45 = vld [vmem:[#allocation2 + $0x48] sm:$0xff] }
  0x48   : > { %6595 = vst [vmem:[#allocation22_spill] sm:$0xff] %v5910_v45  ;;  %v5912_v46 = vld [vmem:[#allocation2 + $0x10a] sm:$0xff]  ;;  %v5924_v48 = vld [vmem:[#allocation2 + $0x112] sm:$0xff]  ;;  %v5926_v49 = vld [vmem:[#allocation2 + $0x60] sm:$0xff] }
  0x49   : > { %v5922_v47 = vld [vmem:[#allocation2 + $0x50] sm:$0xff]  ;;  %6597 = vst [vmem:[#allocation24_spill] sm:$0xff] %v5926_v49  ;;  %v5928_v5 = vld [vmem:[#allocation2 + $0x122] sm:$0xff] }
  0x4a   : > { %4669 = vmatmul.mubr.msk.f32.gmra.mrb[14].mxu1 %vm308_vm1, %v5724_v58  ;;  %4866 = vmatmul.mubr.msk.f32.gmra.mrb[12].mxu0 %vm308_vm1, %v5724_v58  ;;  %6596 = vst [vmem:[#allocation23_spill] sm:$0xff] %v5922_v47  ;;  %v5938_v51 = vld [vmem:[#allocation2 + $0x68] sm:$0xff] }
  0x4b   : > { %4671 = vmatprep.mubr.msk.f32.mxu1 %vm308_vm1, %v5726_v59  ;;  %4868 = vmatprep.mubr.msk.f32.mxu0 %vm308_vm1, %v5726_v59  ;;  %6598 = vst [vmem:[#allocation25_spill] sm:$0xff] %v5938_v51 }
  0x4e   : > { %4672 = vmatmul.mubr.msk.f32.gmra.mrb[16].mxu1 %vm308_vm1, %v5736_v60  ;;  %4869 = vmatmul.mubr.msk.f32.gmra.mrb[14].mxu0 %vm308_vm1, %v5736_v60  ;;  %v6016_v60 = vld [vmem:[#allocation2 + $0xe0] sm:$0xff] }
  0x4f   : > { %4674 = vmatprep.mubr.msk.f32.mxu1 %vm308_vm1, %v5738_v61  ;;  %4897 = vmatprep.mubr.msk.f32.mxu0 %vm308_vm1, %v5740_v62  ;;  %v6004_v61 = vld [vmem:[#allocation2 + $0x18a] sm:$0xff] }
  0x50   : > { %6606 = vst [vmem:[#allocation33_spill] sm:$0xff] %v6004_v61 }
  0x52   : > { %4675 = vmatmul.mubr.msk.f32.gmra.mrb[18].mxu1 %vm308_vm1, %v5750_v63  ;;  %4898 = vmatmul.mubr.msk.f32.vlgmr.msra.gmra.mrb[0].mxu0 %vm308_vm1, %v5752_v0  ;;  %v5992_v63 = vld [vmem:[#allocation2 + $0x182] sm:$0xff] }
  0x53   : > { %4946 = vmatpush3.msk.msra.mxu0 %vm560_vm0, %v5596_v14  ;;  %4677 = vmatprep.mubr.msk.f32.mxu1 %vm308_vm1, %v5754_v1  ;;  %v5793_v14 = vld [vmem:[#allocation2 + $0x52] sm:$0xff]  ;;  %v5990_v1 = vld [vmem:[#allocation2 + $0xc0] sm:$0xff]  ;;  %6605 = vst [vmem:[#allocation32_spill] sm:$0xff] %v5992_v63 }
  0x54   : > { %4900 = vmatprep.mubr.msk.f32.mxu0 %vm308_vm1, %v5756_v3  ;;  %4995 = vmatprep.subr.msk.mxu0 %vm560_vm0, %v5761_v7 }
  0x56   : > { %4678 = vmatmul.mubr.msk.f32.gmra.mrb[20].mxu1 %vm308_vm1, %v5771_v8  ;;  %4901 = vmatmul.mubr.msk.f32.gmra.mrb[2].mxu0 %vm308_vm1, %v5773_v9  ;;  %v5988_v8 = vld [vmem:[#allocation2 + $0x172] sm:$0xff] }
  0x57   : > { %4680 = vmatprep.mubr.msk.f32.mxu1 %vm308_vm1, %v5777_v11  ;;  %4903 = vmatprep.mubr.msk.f32.mxu0 %vm308_vm1, %v5779_v12  ;;  %v5986_v11 = vld [vmem:[#allocation2 + $0xb0] sm:$0xff]  ;;  %6604 = vst [vmem:[#allocation31_spill] sm:$0xff] %v5988_v8 }
  0x58   : > { %6603 = vst [vmem:[#allocation30_spill] sm:$0xff] %v5986_v11 }
  0x5a   : > { %4681 = vmatmul.mubr.msk.f32.gmra.mrb[22].mxu1 %vm308_vm1, %v5791_v13  ;;  %4904 = vmatmul.mubr.msk.f32.gmra.mrb[4].mxu0 %vm308_vm1, %v5793_v14  ;;  %v5976_v13 = vld [vmem:[#allocation2 + $0x16a] sm:$0xff] }
  0x5b   : > { %4683 = vmatprep.mubr.msk.f32.mxu1 %vm308_vm1, %v5795_v15  ;;  %4906 = vmatprep.mubr.msk.f32.mxu0 %vm308_vm1, %v5797_v16  ;;  %v5974_v15 = vld [vmem:[#allocation2 + $0xa8] sm:$0xff] }
  0x5e   : > { %4684 = vmatmul.mubr.msk.f32.gmra.mrb[24].mxu1 %vm308_vm1, %v5807_v17  ;;  %4907 = vmatmul.mubr.msk.f32.gmra.mrb[6].mxu0 %vm308_vm1, %v5809_v18  ;;  %v5972_v17 = vld [vmem:[#allocation2 + $0x15a] sm:$0xff] }
  0x5f   : > { %4686 = vmatprep.mubr.msk.f32.mxu1 %vm308_vm1, %v5811_v19  ;;  %4909 = vmatprep.mubr.msk.f32.mxu0 %vm308_vm1, %v5813_v20  ;;  %v5970_v19 = vld [vmem:[#allocation2 + $0x98] sm:$0xff] }
  0x60   : > { %6602 = vst [vmem:[#allocation29_spill] sm:$0xff] %v5970_v19 }
  0x62   : > { %4687 = vmatmul.mubr.msk.f32.gmra.mrb[26].mxu1 %vm308_vm1, %v5823_v22  ;;  %4910 = vmatmul.mubr.msk.f32.gmra.mrb[8].mxu0 %vm308_vm1, %v5825_v23  ;;  %v5960_v22 = vld [vmem:[#allocation2 + $0x152] sm:$0xff] }
  0x63   : > { %4689 = vmatprep.mubr.msk.f32.mxu1 %vm308_vm1, %v5827_v24  ;;  %4912 = vmatprep.mubr.msk.f32.mxu0 %vm308_vm1, %v5829_v25  ;;  %v5958_v24 = vld [vmem:[#allocation2 + $0x90] sm:$0xff] }
  0x64   : > { %6601 = vst [vmem:[#allocation28_spill] sm:$0xff] %v5958_v24 }
  0x66   : > { %4690 = vmatmul.mubr.msk.f32.gmra.mrb[28].mxu1 %vm308_vm1, %v5839_v26  ;;  %4913 = vmatmul.mubr.msk.f32.gmra.mrb[10].mxu0 %vm308_vm1, %v5841_v27  ;;  %v5956_v26 = vld [vmem:[#allocation2 + $0x142] sm:$0xff] }
  0x67   : > { %4692 = vmatprep.mubr.msk.f32.mxu1 %vm308_vm1, %v5843_v28  ;;  %4915 = vmatprep.mubr.msk.f32.mxu0 %vm308_vm1, %v5845_v29  ;;  %v5954_v28 = vld [vmem:[#allocation2 + $0x80] sm:$0xff] }
  0x68   : > { %6600 = vst [vmem:[#allocation27_spill] sm:$0xff] %v5954_v28 }
  0x6a   : > { %4693 = vmatmul.mubr.msk.f32.gmra.mrb[30].mxu1 %vm308_vm1, %v5855_v30  ;;  %4916 = vmatmul.mubr.msk.f32.gmra.mrb[12].mxu0 %vm308_vm1, %v5857_v31  ;;  %v5944_v30 = vld [vmem:[#allocation2 + $0x13a] sm:$0xff] }
  0x6b   : > { %4697 = vmatprep.mubr.msk.f32.mxu1 %vm308_vm1, %v397_v32  ;;  %4918 = vmatprep.mubr.msk.f32.mxu0 %vm308_vm1, %v5859_v33  ;;  %v5940_v32 = vld [vmem:[#allocation2 + $0x12a] sm:$0xff] }
  0x6e   : > { %4698 = vmatmul.mubr.msk.f32.vlgmr.msra.gmra.mrb[0].mxu1 %vm308_vm1, %v398_v34  ;;  %4919 = vmatmul.mubr.msk.f32.gmra.mrb[14].mxu0 %vm308_vm1, %v5868_v35  ;;  %v5942_v34 = vld [vmem:[#allocation2 + $0x78] sm:$0xff] }
  0x6f   : > { %4700 = vmatprep.mubr.msk.f32.mxu1 %vm308_vm1, %v5870_v36  ;;  %4921 = vmatprep.mubr.msk.f32.mxu0 %vm308_vm1, %v5872_v38  ;;  %6599 = vst [vmem:[#allocation26_spill] sm:$0xff] %v5942_v34  ;;  %v6006_v36 = vld [vmem:[#allocation2 + $0xd8] sm:$0xff] }
  0x70   : > { %4746 = vmatpush3.msk.msra.mxu1 %vm560_vm0, %v5513_v10  ;;  %v5906_v10 = vld [vmem:[#allocation2 + $0x38] sm:$0xff] }
  0x71   : > { %4795 = vmatprep.subr.msk.mxu1 %vm560_vm0, %v5880_v39  ;;  %6594 = vst [vmem:[#allocation21_spill] sm:$0xff] %v5906_v10 }
  0x72   : > { %4701 = vmatmul.mubr.msk.f32.gmra.mrb[2].mxu1 %vm308_vm1, %v5886_v40  ;;  %4922 = vmatmul.mubr.msk.f32.gmra.mrb[16].mxu0 %vm308_vm1, %v5888_v4  ;;  %v6002_v40 = vld [vmem:[#allocation2 + $0xc8] sm:$0xff] }
  0x73   : > { %4703 = vmatprep.mubr.msk.f32.mxu1 %vm308_vm1, %v5892_v42  ;;  %4924 = vmatprep.mubr.msk.f32.mxu0 %vm308_vm1, %v5894_v43 }
  0x76   : > { %4704 = vmatmul.mubr.msk.f32.gmra.mrb[4].mxu1 %vm308_vm1, %v5906_v10  ;;  %4925 = vmatmul.mubr.msk.f32.gmra.mrb[18].mxu0 %vm308_vm1, %v5908_v44 }
  0x77   : > { %4706 = vmatprep.mubr.msk.f32.mxu1 %vm308_vm1, %v5910_v45  ;;  %4927 = vmatprep.mubr.msk.f32.mxu0 %vm308_vm1, %v5912_v46 }
  0x7a   : > { %4707 = vmatmul.mubr.msk.f32.gmra.mrb[6].mxu1 %vm308_vm1, %v5922_v47  ;;  %4928 = vmatmul.mubr.msk.f32.gmra.mrb[20].mxu0 %vm308_vm1, %v5924_v48 }
  0x7b   : > { %4709 = vmatprep.mubr.msk.f32.mxu1 %vm308_vm1, %v5926_v49  ;;  %4930 = vmatprep.mubr.msk.f32.mxu0 %vm308_vm1, %v5928_v5 }
  0x7e   : > { %4710 = vmatmul.mubr.msk.f32.gmra.mrb[8].mxu1 %vm308_vm1, %v5938_v51  ;;  %4931 = vmatmul.mubr.msk.f32.gmra.mrb[22].mxu0 %vm308_vm1, %v5940_v32 }
  0x7f   : > { %4712 = vmatprep.mubr.msk.f32.mxu1 %vm308_vm1, %v5942_v34  ;;  %4933 = vmatprep.mubr.msk.f32.mxu0 %vm308_vm1, %v5944_v30 }
  0x82   : > { %4713 = vmatmul.mubr.msk.f32.gmra.mrb[10].mxu1 %vm308_vm1, %v5954_v28  ;;  %4934 = vmatmul.mubr.msk.f32.gmra.mrb[24].mxu0 %vm308_vm1, %v5956_v26 }
  0x83   : > { %4715 = vmatprep.mubr.msk.f32.mxu1 %vm308_vm1, %v5958_v24  ;;  %4936 = vmatprep.mubr.msk.f32.mxu0 %vm308_vm1, %v5960_v22 }
  0x86   : > { %4716 = vmatmul.mubr.msk.f32.gmra.mrb[12].mxu1 %vm308_vm1, %v5970_v19  ;;  %4937 = vmatmul.mubr.msk.f32.gmra.mrb[26].mxu0 %vm308_vm1, %v5972_v17 }
  0x87   : > { %4718 = vmatprep.mubr.msk.f32.mxu1 %vm308_vm1, %v5974_v15  ;;  %4939 = vmatprep.mubr.msk.f32.mxu0 %vm308_vm1, %v5976_v13 }
  0x8a   : > { %4719 = vmatmul.mubr.msk.f32.gmra.mrb[14].mxu1 %vm308_vm1, %v5986_v11  ;;  %4940 = vmatmul.mubr.msk.f32.gmra.mrb[28].mxu0 %vm308_vm1, %v5988_v8  ;;  %v6023_v8 = vld [vmem:[%s6528_s2 + $0x20] sm:$0xf] }
  0x8b   : > { %4721 = vmatprep.mubr.msk.f32.mxu1 %vm308_vm1, %v5990_v1  ;;  %4942 = vmatprep.mubr.msk.f32.mxu0 %vm308_vm1, %v5992_v63  ;;  %v6018_v63 = vld [vmem:[#allocation2 + $0xf0] sm:$0xff] }
  0x8e   : > { %4722 = vmatmul.mubr.msk.f32.gmra.mrb[16].mxu1 %vm308_vm1, %v6002_v40  ;;  %4943 = vmatmul.mubr.msk.f32.gmra.mrb[30].mxu0 %vm308_vm1, %v6004_v61  ;;  %v6033_v61 = vld [vmem:[#allocation2 + $0xf8] sm:$0xff] }
  0x8f   : > { %4724 = vmatprep.mubr.msk.f32.mxu1 %vm308_vm1, %v6006_v36  ;;  %4947 = vmatprep.mubr.msk.f32.mxu0 %vm308_vm1, %v5892_v42  ;;  %v6037_v42 = vld [vmem:[#allocation2 + $0x108] sm:$0xff] }
  0x92   : > { %4725 = vmatmul.mubr.msk.f32.gmra.mrb[18].mxu1 %vm308_vm1, %v6016_v60  ;;  %4948 = vmatmul.mubr.msk.f32.vlgmr.msra.gmra.mrb[0].mxu0 %vm308_vm1, %v5906_v10  ;;  %v6063_v10 = vld [vmem:[#allocation2 + $0x138] sm:$0xff] }
  0x93   : > { %4996 = vmatpush3.msk.msra.mxu0 %vm560_vm0, %v5761_v7  ;;  %4727 = vmatprep.mubr.msk.f32.mxu1 %vm308_vm1, %v6018_v63  ;;  %v6049_v7 = vld [vmem:[#allocation2 + $0x110] sm:$0xff] }
  0x94   : > { %4950 = vmatprep.mubr.msk.f32.mxu0 %vm308_vm1, %v5910_v45  ;;  %5045 = vmatprep.subr.msk.mxu0 %vm560_vm0, %v6023_v8  ;;  %v6051_v45 = vld [vmem:[#allocation2 + $0x120] sm:$0xff] }
  0x96   : > { %4728 = vmatmul.mubr.msk.f32.gmra.mrb[20].mxu1 %vm308_vm1, %v6033_v61  ;;  %4951 = vmatmul.mubr.msk.f32.gmra.mrb[2].mxu0 %vm308_vm1, %v5922_v47  ;;  %v6061_v47 = vld [vmem:[#allocation2 + $0x128] sm:$0xff] }
  0x97   : > { %4730 = vmatprep.mubr.msk.f32.mxu1 %vm308_vm1, %v6037_v42  ;;  %4953 = vmatprep.mubr.msk.f32.mxu0 %vm308_vm1, %v5926_v49  ;;  %v6075_v49 = vld [vmem:[#allocation2 + $0x150] sm:$0xff] }
  0x9a   : > { %4731 = vmatmul.mubr.msk.f32.gmra.mrb[22].mxu1 %vm308_vm1, %v6049_v7  ;;  %4954 = vmatmul.mubr.msk.f32.gmra.mrb[4].mxu0 %vm308_vm1, %v5938_v51  ;;  %v6073_v51 = vld [vmem:[#allocation2 + $0x140] sm:$0xff] }
  0x9b   : > { %4733 = vmatprep.mubr.msk.f32.mxu1 %vm308_vm1, %v6051_v45  ;;  %4956 = vmatprep.mubr.msk.f32.mxu0 %vm308_vm1, %v5942_v34  ;;  %v6087_v34 = vld [vmem:[#allocation2 + $0x168] sm:$0xff] }
  0x9e   : > { %4734 = vmatmul.mubr.msk.f32.gmra.mrb[24].mxu1 %vm308_vm1, %v6061_v47  ;;  %4957 = vmatmul.mubr.msk.f32.gmra.mrb[6].mxu0 %vm308_vm1, %v5954_v28  ;;  %v6085_v28 = vld [vmem:[#allocation2 + $0x158] sm:$0xff] }
  0x9f   : > { %4736 = vmatprep.mubr.msk.f32.mxu1 %vm308_vm1, %v6063_v10  ;;  %4959 = vmatprep.mubr.msk.f32.mxu0 %vm308_vm1, %v5958_v24  ;;  %v1113_v24 = vld [vmem:[#allocation2 + $0x2] sm:$0xff] }
  0xa2   : > { %4737 = vmatmul.mubr.msk.f32.gmra.mrb[26].mxu1 %vm308_vm1, %v6073_v51  ;;  %4960 = vmatmul.mubr.msk.f32.gmra.mrb[8].mxu0 %vm308_vm1, %v5970_v19  ;;  %v6097_v19 = vld [vmem:[#allocation2 + $0x170] sm:$0xff] }
  0xa3   : > { %4739 = vmatprep.mubr.msk.f32.mxu1 %vm308_vm1, %v6075_v49  ;;  %4962 = vmatprep.mubr.msk.f32.mxu0 %vm308_vm1, %v5974_v15 }
  0xa6   : > { %4740 = vmatmul.mubr.msk.f32.gmra.mrb[28].mxu1 %vm308_vm1, %v6085_v28  ;;  %4963 = vmatmul.mubr.msk.f32.gmra.mrb[10].mxu0 %vm308_vm1, %v5986_v11  ;;  %v1114_v11 = vld [vmem:[#allocation2 + $0xa] sm:$0xff] }
  0xa7   : > { %4742 = vmatprep.mubr.msk.f32.mxu1 %vm308_vm1, %v6087_v34  ;;  %4965 = vmatprep.mubr.msk.f32.mxu0 %vm308_vm1, %v5990_v1 }
  0xaa   : > { %4743 = vmatmul.mubr.msk.f32.gmra.mrb[30].mxu1 %vm308_vm1, %v6097_v19  ;;  %4966 = vmatmul.mubr.msk.f32.gmra.mrb[12].mxu0 %vm308_vm1, %v6002_v40 }
  0xab   : > { %4747 = vmatprep.mubr.msk.f32.mxu1 %vm308_vm1, %v1113_v24  ;;  %4968 = vmatprep.mubr.msk.f32.mxu0 %vm308_vm1, %v6006_v36  ;;  %v2705_v24 = vld [vmem:[#allocation2 + $0x1a0] sm:$0xff] }
  0xae   : > { %4748 = vmatmul.mubr.msk.f32.vlgmr.msra.gmra.mrb[0].mxu1 %vm308_vm1, %v1114_v11  ;;  %4969 = vmatmul.mubr.msk.f32.gmra.mrb[14].mxu0 %vm308_vm1, %v6016_v60  ;;  %v2704_v11 = vld [vmem:[#allocation2 + $0x198] sm:$0xff] }
  0xaf   : > { %4750 = vmatprep.mubr.msk.f32.mxu1 %vm308_vm1, %v5740_v62  ;;  %4971 = vmatprep.mubr.msk.f32.mxu0 %vm308_vm1, %v6018_v63  ;;  %v6157_v62 = vld [vmem:[#allocation2 + $0x180] sm:$0xff] }
  0xb0   : > { %4796 = vmatpush3.msk.msra.mxu1 %vm560_vm0, %v5880_v39  ;;  %v6621_v39 = vld [vmem:[#allocation24_spill] sm:$0xff] }
  0xb1   : > { %5095 = vmatprep.subr.msk.mxu1 %vm560_vm0, %v5465_v2 }
  0xb2   : > { %4751 = vmatmul.mubr.msk.f32.gmra.mrb[2].mxu1 %vm308_vm1, %v5752_v0  ;;  %4972 = vmatmul.mubr.msk.f32.gmra.mrb[16].mxu0 %vm308_vm1, %v6033_v61  ;;  %v6167_v0 = vld [vmem:[#allocation2 + $0x188] sm:$0xff] }
  0xb3   : > { %4753 = vmatprep.mubr.msk.f32.mxu1 %vm308_vm1, %v5756_v3  ;;  %4974 = vmatprep.mubr.msk.f32.mxu0 %vm308_vm1, %v6037_v42 }
  0xb6   : > { %4754 = vmatmul.mubr.msk.f32.gmra.mrb[4].mxu1 %vm308_vm1, %v5773_v9  ;;  %4975 = vmatmul.mubr.msk.f32.gmra.mrb[18].mxu0 %vm308_vm1, %v6049_v7 }
  0xb7   : > { %4756 = vmatprep.mubr.msk.f32.mxu1 %vm308_vm1, %v5779_v12  ;;  %4977 = vmatprep.mubr.msk.f32.mxu0 %vm308_vm1, %v6051_v45 }
  0xba   : > { %4757 = vmatmul.mubr.msk.f32.gmra.mrb[6].mxu1 %vm308_vm1, %v5793_v14  ;;  %4978 = vmatmul.mubr.msk.f32.gmra.mrb[20].mxu0 %vm308_vm1, %v6061_v47 }
  0xbb   : > { %4759 = vmatprep.mubr.msk.f32.mxu1 %vm308_vm1, %v5797_v16  ;;  %4980 = vmatprep.mubr.msk.f32.mxu0 %vm308_vm1, %v6063_v10 }
  0xbe   : > { %4760 = vmatmul.mubr.msk.f32.gmra.mrb[8].mxu1 %vm308_vm1, %v5809_v18  ;;  %4981 = vmatmul.mubr.msk.f32.gmra.mrb[22].mxu0 %vm308_vm1, %v6073_v51 }
  0xbf   : > { %4762 = vmatprep.mubr.msk.f32.mxu1 %vm308_vm1, %v5813_v20  ;;  %4983 = vmatprep.mubr.msk.f32.mxu0 %vm308_vm1, %v6075_v49 }
  0xc2   : > { %4763 = vmatmul.mubr.msk.f32.gmra.mrb[10].mxu1 %vm308_vm1, %v5825_v23  ;;  %4984 = vmatmul.mubr.msk.f32.gmra.mrb[24].mxu0 %vm308_vm1, %v6085_v28 }
  0xc3   : > { %4765 = vmatprep.mubr.msk.f32.mxu1 %vm308_vm1, %v5829_v25  ;;  %4986 = vmatprep.mubr.msk.f32.mxu0 %vm308_vm1, %v6087_v34 }
  0xc6   : > { %4766 = vmatmul.mubr.msk.f32.gmra.mrb[12].mxu1 %vm308_vm1, %v5841_v27  ;;  %4987 = vmatmul.mubr.msk.f32.gmra.mrb[26].mxu0 %vm308_vm1, %v6097_v19 }
  0xc7   : > { %4768 = vmatprep.mubr.msk.f32.mxu1 %vm308_vm1, %v5845_v29  ;;  %4989 = vmatprep.mubr.msk.f32.mxu0 %vm308_vm1, %v6157_v62 }
  0xca   : > { %4769 = vmatmul.mubr.msk.f32.gmra.mrb[14].mxu1 %vm308_vm1, %v5857_v31  ;;  %4990 = vmatmul.mubr.msk.f32.gmra.mrb[28].mxu0 %vm308_vm1, %v6167_v0 }
  0xcb   : > { %4771 = vmatprep.mubr.msk.f32.mxu1 %vm308_vm1, %v5859_v33  ;;  %4992 = vmatprep.mubr.msk.f32.mxu0 %vm308_vm1, %v2704_v11  ;;  %v6623_v11 = vld [vmem:[#allocation25_spill] sm:$0xff] }
  0xce   : > { %4772 = vmatmul.mubr.msk.f32.gmra.mrb[16].mxu1 %vm308_vm1, %v5868_v35  ;;  %4993 = vmatmul.mubr.msk.f32.gmra.mrb[30].mxu0 %vm308_vm1, %v2705_v24  ;;  %v6624_v24 = vld [vmem:[#allocation11_spill] sm:$0xff] }
  0xcf   : > { %4774 = vmatprep.mubr.msk.f32.mxu1 %vm308_vm1, %v5872_v38  ;;  %4997 = vmatprep.mubr.msk.f32.mxu0 %vm308_vm1, %v5602_v21  ;;  %v6607_v21 = vld [vmem:[#allocation31_spill] sm:$0xff] }
  0xd2   : > { %4775 = vmatmul.mubr.msk.f32.gmra.mrb[18].mxu1 %vm308_vm1, %v5888_v4  ;;  %4998 = vmatmul.mubr.msk.f32.vlgmr.msra.gmra.mrb[0].mxu0 %vm308_vm1, %v5634_v37  ;;  %v6608_v37 = vld [vmem:[#allocation3_spill] sm:$0xff] }
  0xd3   : > { %5046 = vmatpush3.msk.msra.mxu0 %vm560_vm0, %v6023_v8  ;;  %4777 = vmatprep.mubr.msk.f32.mxu1 %vm308_vm1, %v5894_v43  ;;  %v6620_v8 = vld [vmem:[#allocation9_spill] sm:$0xff] }
  0xd4   : > { %5000 = vmatprep.mubr.msk.f32.mxu0 %vm308_vm1, %v5642_v41  ;;  %v6609_v41 = vld [vmem:[#allocation18_spill] sm:$0xff] }
  0xd6   : > { %4778 = vmatmul.mubr.msk.f32.gmra.mrb[20].mxu1 %vm308_vm1, %v5908_v44  ;;  %5001 = vmatmul.mubr.msk.f32.gmra.mrb[2].mxu0 %vm308_vm1, %v5668_v50  ;;  %v6610_v50 = vld [vmem:[#allocation4_spill] sm:$0xff] }
  0xd7   : > { %4780 = vmatprep.mubr.msk.f32.mxu1 %vm308_vm1, %v5912_v46  ;;  %5003 = vmatprep.mubr.msk.f32.mxu0 %vm308_vm1, %v5673_v52  ;;  %v6611_v52 = vld [vmem:[#allocation19_spill] sm:$0xff] }
  0xda   : > { %4781 = vmatmul.mubr.msk.f32.gmra.mrb[22].mxu1 %vm308_vm1, %v5924_v48  ;;  %5004 = vmatmul.mubr.msk.f32.gmra.mrb[4].mxu0 %vm308_vm1, %v5688_v6  ;;  %v6612_v6 = vld [vmem:[#allocation5_spill] sm:$0xff] }
  0xdb   : > { %4783 = vmatprep.mubr.msk.f32.mxu1 %vm308_vm1, %v5928_v5  ;;  %5006 = vmatprep.mubr.msk.f32.mxu0 %vm308_vm1, %v5690_v53  ;;  %v6613_v53 = vld [vmem:[#allocation20_spill] sm:$0xff] }
  0xde   : > { %4784 = vmatmul.mubr.msk.f32.gmra.mrb[24].mxu1 %vm308_vm1, %v5940_v32  ;;  %5007 = vmatmul.mubr.msk.f32.gmra.mrb[6].mxu0 %vm308_vm1, %v5700_v54  ;;  %v6614_v54 = vld [vmem:[#allocation6_spill] sm:$0xff] }
  0xdf   : > { %4786 = vmatprep.mubr.msk.f32.mxu1 %vm308_vm1, %v5944_v30  ;;  %5009 = vmatprep.mubr.msk.f32.mxu0 %vm308_vm1, %v5702_v55  ;;  %v6615_v55 = vld [vmem:[#allocation21_spill] sm:$0xff] }
  0xe2   : > { %4787 = vmatmul.mubr.msk.f32.gmra.mrb[26].mxu1 %vm308_vm1, %v5956_v26  ;;  %5010 = vmatmul.mubr.msk.f32.gmra.mrb[8].mxu0 %vm308_vm1, %v5712_v56  ;;  %v6616_v56 = vld [vmem:[#allocation7_spill] sm:$0xff] }
  0xe3   : > { %4789 = vmatprep.mubr.msk.f32.mxu1 %vm308_vm1, %v5960_v22  ;;  %5012 = vmatprep.mubr.msk.f32.mxu0 %vm308_vm1, %v5714_v57  ;;  %v6617_v57 = vld [vmem:[#allocation22_spill] sm:$0xff] }
  0xe6   : > { %4790 = vmatmul.mubr.msk.f32.gmra.mrb[28].mxu1 %vm308_vm1, %v5972_v17  ;;  %5013 = vmatmul.mubr.msk.f32.gmra.mrb[10].mxu0 %vm308_vm1, %v5724_v58  ;;  %v6618_v58 = vld [vmem:[#allocation8_spill] sm:$0xff] }
  0xe7   : > { %4792 = vmatprep.mubr.msk.f32.mxu1 %vm308_vm1, %v5976_v13  ;;  %5015 = vmatprep.mubr.msk.f32.mxu0 %vm308_vm1, %v5726_v59  ;;  %v6619_v59 = vld [vmem:[#allocation23_spill] sm:$0xff] }
  0xea   : > { %4793 = vmatmul.mubr.msk.f32.gmra.mrb[30].mxu1 %vm308_vm1, %v6607_v21  ;;  %5016 = vmatmul.mubr.msk.f32.gmra.mrb[12].mxu0 %vm308_vm1, %v6608_v37  ;;  %v6625_v37 = vld [vmem:[#allocation26_spill] sm:$0xff] }
  0xeb   : > { %4797 = vmatprep.mubr.msk.f32.mxu1 %vm308_vm1, %v6609_v41  ;;  %5018 = vmatprep.mubr.msk.f32.mxu0 %vm308_vm1, %v6610_v50  ;;  %v6626_v41 = vld [vmem:[#allocation12_spill] sm:$0xff]  ;;  %v6627_v50 = vld [vmem:[#allocation27_spill] sm:$0xff] }
  0xee   : > { %4798 = vmatmul.mubr.msk.f32.vlgmr.msra.gmra.mrb[0].mxu1 %vm308_vm1, %v6611_v52  ;;  %5019 = vmatmul.mubr.msk.f32.gmra.mrb[14].mxu0 %vm308_vm1, %v6612_v6  ;;  %v6628_v52 = vld [vmem:[#allocation13_spill] sm:$0xff] }
  0xef   : > { %4800 = vmatprep.mubr.msk.f32.mxu1 %vm308_vm1, %v6613_v53  ;;  %5021 = vmatprep.mubr.msk.f32.mxu0 %vm308_vm1, %v6614_v54  ;;  %v6629_v53 = vld [vmem:[#allocation28_spill] sm:$0xff] }
  0xf0   : > { %5096 = vmatpush3.msk.msra.mxu1 %vm560_vm0, %v5465_v2  ;;  %v6622_v2 = vld [vmem:[#allocation10_spill] sm:$0xff] }
  0xf2   : > { %4801 = vmatmul.mubr.msk.f32.gmra.mrb[2].mxu1 %vm308_vm1, %v6615_v55  ;;  %5022 = vmatmul.mubr.msk.f32.gmra.mrb[16].mxu0 %vm308_vm1, %v6616_v56  ;;  %v6630_v55 = vld [vmem:[#allocation14_spill] sm:$0xff] }
  0xf3   : > { %4803 = vmatprep.mubr.msk.f32.mxu1 %vm308_vm1, %v6617_v57  ;;  %5024 = vmatprep.mubr.msk.f32.mxu0 %vm308_vm1, %v6618_v58  ;;  %v6631_v57 = vld [vmem:[#allocation29_spill] sm:$0xff] }
  0xf6   : > { %4804 = vmatmul.mubr.msk.f32.gmra.mrb[4].mxu1 %vm308_vm1, %v6619_v59  ;;  %5025 = vmatmul.mubr.msk.f32.gmra.mrb[18].mxu0 %vm308_vm1, %v6620_v8  ;;  %v6632_v59 = vld [vmem:[#allocation15_spill] sm:$0xff] }
  0xf7   : > { %4806 = vmatprep.mubr.msk.f32.mxu1 %vm308_vm1, %v6621_v39  ;;  %5027 = vmatprep.mubr.msk.f32.mxu0 %vm308_vm1, %v6622_v2  ;;  %v6633_v39 = vld [vmem:[#allocation16_spill] sm:$0xff] }
  0xfa   : > { %4807 = vmatmul.mubr.msk.f32.gmra.mrb[6].mxu1 %vm308_vm1, %v6623_v11  ;;  %5028 = vmatmul.mubr.msk.f32.gmra.mrb[20].mxu0 %vm308_vm1, %v6624_v24  ;;  %v6291_v11 = vld [vmem:[#allocation2 + $0x181] sm:$0xff] }
  0xfb   : > { %4809 = vmatprep.mubr.msk.f32.mxu1 %vm308_vm1, %v6625_v37  ;;  %5030 = vmatprep.mubr.msk.f32.mxu0 %vm308_vm1, %v6626_v41  ;;  %v6634_v37 = vld [vmem:[#allocation30_spill] sm:$0xff] }
  0xfe   : > { %4810 = vmatmul.mubr.msk.f32.gmra.mrb[8].mxu1 %vm308_vm1, %v6627_v50  ;;  %5031 = vmatmul.mubr.msk.f32.gmra.mrb[22].mxu0 %vm308_vm1, %v6628_v52  ;;  %v6635_v50 = vld [vmem:[#allocation17_spill] sm:$0xff] }
  0xff   : > { %4812 = vmatprep.mubr.msk.f32.mxu1 %vm308_vm1, %v6629_v53  ;;  %5033 = vmatprep.mubr.msk.f32.mxu0 %vm308_vm1, %v6630_v55  ;;  %v6301_v53 = vld [vmem:[#allocation2 + $0x189] sm:$0xff] }
 0x102   : > { %4813 = vmatmul.mubr.msk.f32.gmra.mrb[10].mxu1 %vm308_vm1, %v6631_v57  ;;  %5034 = vmatmul.mubr.msk.f32.gmra.mrb[24].mxu0 %vm308_vm1, %v6632_v59  ;;  %v3095_v57 = vld [vmem:[#allocation2 + $0x1a1] sm:$0xff] }
 0x103   : > { %4815 = vmatprep.mubr.msk.f32.mxu1 %vm308_vm1, %v5974_v15  ;;  %5036 = vmatprep.mubr.msk.f32.mxu0 %vm308_vm1, %v6633_v39  ;;  %v3094_v15 = vld [vmem:[#allocation2 + $0x199] sm:$0xff] }
 0x106   : > { %4816 = vmatmul.mubr.msk.f32.gmra.mrb[12].mxu1 %vm308_vm1, %v6634_v37  ;;  %5037 = vmatmul.mubr.msk.f32.gmra.mrb[26].mxu0 %vm308_vm1, %v6635_v50 }
 0x107   : > { %4818 = vmatprep.mubr.msk.f32.mxu1 %vm308_vm1, %v5990_v1  ;;  %5039 = vmatprep.mubr.msk.f32.mxu0 %vm308_vm1, %v6291_v11  ;;  %v6637_v1 = vld [vmem:[#allocation33_spill] sm:$0xff] }
 0x10a   : > { %4819 = vmatmul.mubr.msk.f32.gmra.mrb[14].mxu1 %vm308_vm1, %v6002_v40  ;;  %5040 = vmatmul.mubr.msk.f32.gmra.mrb[28].mxu0 %vm308_vm1, %v6301_v53 }
 0x10b   : > { %4821 = vmatprep.mubr.msk.f32.mxu1 %vm308_vm1, %v6006_v36  ;;  %5042 = vmatprep.mubr.msk.f32.mxu0 %vm308_vm1, %v3094_v15 }
 0x10e   : > { %4822 = vmatmul.mubr.msk.f32.gmra.mrb[16].mxu1 %vm308_vm1, %v6016_v60  ;;  %5043 = vmatmul.mubr.msk.f32.gmra.mrb[30].mxu0 %vm308_vm1, %v3095_v57  ;;  %v1909_v60 = vld [vmem:[#allocation2 + $0xd9] sm:$0xff] }
 0x10f   : > { %4824 = vmatprep.mubr.msk.f32.mxu1 %vm308_vm1, %v6018_v63  ;;  %5047 = vmatprep.mubr.msk.f32.mxu0 %vm308_vm1, %v5756_v3  ;;  %v3484_v63 = vld [vmem:[#allocation2 + $0x19a] sm:$0xff]  ;;  %v3485_v3 = vld [vmem:[#allocation2 + $0x1a2] sm:$0xff] }
 0x112   : > { %4825 = vmatmul.mubr.msk.f32.gmra.mrb[18].mxu1 %vm308_vm1, %v6033_v61  ;;  %5048 = vmatmul.mubr.msk.f32.vlgmr.msra.gmra.mrb[0].mxu0 %vm308_vm1, %v5773_v9  ;;  %v6636_v61 = vld [vmem:[#allocation32_spill] sm:$0xff] }
 0x113   : > { %4827 = vmatprep.mubr.msk.f32.mxu1 %vm308_vm1, %v6037_v42  ;;  %5050 = vmatprep.mubr.msk.f32.mxu0 %vm308_vm1, %v5779_v12 }
 0x116   : > { %4828 = vmatmul.mubr.msk.f32.gmra.mrb[20].mxu1 %vm308_vm1, %v6049_v7  ;;  %5051 = vmatmul.mubr.msk.f32.gmra.mrb[2].mxu0 %vm308_vm1, %v5793_v14 }
 0x117   : > { %4830 = vmatprep.mubr.msk.f32.mxu1 %vm308_vm1, %v6051_v45  ;;  %5053 = vmatprep.mubr.msk.f32.mxu0 %vm308_vm1, %v5797_v16 }
 0x11a   : > { %4831 = vmatmul.mubr.msk.f32.gmra.mrb[22].mxu1 %vm308_vm1, %v6061_v47  ;;  %5054 = vmatmul.mubr.msk.f32.gmra.mrb[4].mxu0 %vm308_vm1, %v5809_v18 }
 0x11b   : > { %4833 = vmatprep.mubr.msk.f32.mxu1 %vm308_vm1, %v6063_v10  ;;  %5056 = vmatprep.mubr.msk.f32.mxu0 %vm308_vm1, %v5813_v20 }
 0x11e   : > { %4834 = vmatmul.mubr.msk.f32.gmra.mrb[24].mxu1 %vm308_vm1, %v6073_v51  ;;  %5057 = vmatmul.mubr.msk.f32.gmra.mrb[6].mxu0 %vm308_vm1, %v5825_v23 }
 0x11f   : > { %4836 = vmatprep.mubr.msk.f32.mxu1 %vm308_vm1, %v6075_v49  ;;  %5059 = vmatprep.mubr.msk.f32.mxu0 %vm308_vm1, %v5829_v25 }
 0x122   : > { %4837 = vmatmul.mubr.msk.f32.gmra.mrb[26].mxu1 %vm308_vm1, %v6085_v28  ;;  %5060 = vmatmul.mubr.msk.f32.gmra.mrb[8].mxu0 %vm308_vm1, %v5841_v27 }
 0x123   : > { %4839 = vmatprep.mubr.msk.f32.mxu1 %vm308_vm1, %v6087_v34  ;;  %5062 = vmatprep.mubr.msk.f32.mxu0 %vm308_vm1, %v5845_v29 }
 0x126   : > { %4840 = vmatmul.mubr.msk.f32.gmra.mrb[28].mxu1 %vm308_vm1, %v6097_v19  ;;  %5063 = vmatmul.mubr.msk.f32.gmra.mrb[10].mxu0 %vm308_vm1, %v5857_v31 }
 0x127   : > { %4842 = vmatprep.mubr.msk.f32.mxu1 %vm308_vm1, %v6157_v62  ;;  %5065 = vmatprep.mubr.msk.f32.mxu0 %vm308_vm1, %v5859_v33 }
 0x12a   : > { %4843 = vmatmul.mubr.msk.f32.gmra.mrb[30].mxu1 %vm308_vm1, %v6167_v0  ;;  %5066 = vmatmul.mubr.msk.f32.gmra.mrb[12].mxu0 %vm308_vm1, %v5868_v35 }
 0x12b   : > { %4871 = vmatprep.mubr.msk.f32.mxu1 %vm308_vm1, %v1909_v60  ;;  %5068 = vmatprep.mubr.msk.f32.mxu0 %vm308_vm1, %v5872_v38 }
 0x12e   : > { %4872 = vmatmul.mubr.msk.f32.vlgmr.msra.gmra.mrb[16].mxu1 %vm308_vm1, %v6612_v6  ;;  %5069 = vmatmul.mubr.msk.f32.gmra.mrb[14].mxu0 %vm308_vm1, %v5888_v4 }
 0x12f   : > { %4874 = vmatprep.mubr.msk.f32.mxu1 %vm308_vm1, %v6614_v54  ;;  %5071 = vmatprep.mubr.msk.f32.mxu0 %vm308_vm1, %v5894_v43 }
 0x132   : > { %4875 = vmatmul.mubr.msk.f32.gmra.mrb[18].mxu1 %vm308_vm1, %v6616_v56  ;;  %5072 = vmatmul.mubr.msk.f32.gmra.mrb[16].mxu0 %vm308_vm1, %v5908_v44 }
 0x133   : > { %4877 = vmatprep.mubr.msk.f32.mxu1 %vm308_vm1, %v6618_v58  ;;  %5074 = vmatprep.mubr.msk.f32.mxu0 %vm308_vm1, %v5912_v46 }
 0x136   : > { %4878 = vmatmul.mubr.msk.f32.gmra.mrb[20].mxu1 %vm308_vm1, %v6620_v8  ;;  %5075 = vmatmul.mubr.msk.f32.gmra.mrb[18].mxu0 %vm308_vm1, %v5924_v48 }
 0x137   : > { %4880 = vmatprep.mubr.msk.f32.mxu1 %vm308_vm1, %v6622_v2  ;;  %5077 = vmatprep.mubr.msk.f32.mxu0 %vm308_vm1, %v5928_v5 }
 0x13a   : > { %4881 = vmatmul.mubr.msk.f32.gmra.mrb[22].mxu1 %vm308_vm1, %v6624_v24  ;;  %5078 = vmatmul.mubr.msk.f32.gmra.mrb[20].mxu0 %vm308_vm1, %v5940_v32 }
 0x13b   : > { %4883 = vmatprep.mubr.msk.f32.mxu1 %vm308_vm1, %v6626_v41  ;;  %5080 = vmatprep.mubr.msk.f32.mxu0 %vm308_vm1, %v5944_v30 }
 0x13e   : > { %4884 = vmatmul.mubr.msk.f32.gmra.mrb[24].mxu1 %vm308_vm1, %v6628_v52  ;;  %5081 = vmatmul.mubr.msk.f32.gmra.mrb[22].mxu0 %vm308_vm1, %v5956_v26 }
 0x13f   : > { %4886 = vmatprep.mubr.msk.f32.mxu1 %vm308_vm1, %v6630_v55  ;;  %5083 = vmatprep.mubr.msk.f32.mxu0 %vm308_vm1, %v5960_v22 }
 0x142   : > { %4887 = vmatmul.mubr.msk.f32.gmra.mrb[26].mxu1 %vm308_vm1, %v6632_v59  ;;  %5084 = vmatmul.mubr.msk.f32.gmra.mrb[24].mxu0 %vm308_vm1, %v5972_v17 }
 0x143   : > { %4889 = vmatprep.mubr.msk.f32.mxu1 %vm308_vm1, %v6633_v39  ;;  %5086 = vmatprep.mubr.msk.f32.mxu0 %vm308_vm1, %v5976_v13 }
 0x146   : > { %4890 = vmatmul.mubr.msk.f32.gmra.mrb[28].mxu1 %vm308_vm1, %v6635_v50  ;;  %5087 = vmatmul.mubr.msk.f32.gmra.mrb[26].mxu0 %vm308_vm1, %v6607_v21 }
 0x147   : > { %4892 = vmatprep.mubr.msk.f32.mxu1 %vm308_vm1, %v6291_v11  ;;  %5089 = vmatprep.mubr.msk.f32.mxu0 %vm308_vm1, %v6636_v61 }
 0x14a   : > { %4893 = vmatmul.mubr.msk.f32.gmra.mrb[30].mxu1 %vm308_vm1, %v6301_v53  ;;  %5090 = vmatmul.mubr.msk.f32.gmra.mrb[28].mxu0 %vm308_vm1, %v6637_v1 }
 0x14b   : > { %5092 = vmatprep.mubr.msk.f32.mxu0 %vm308_vm1, %v3484_v63 }
 0x14e   : > { %5093 = vmatmul.mubr.msk.f32.gmra.mrb[30].mxu0 %vm308_vm1, %v3485_v3 }
 0x1c1   : > { %v4799_v9 = vpop.f32.mrb[0].mxu1 }
 0x1c2   : > { %v1702_v12 = vpop.f32.mrb[1].mxu1 }
 0x1c5   : > { %v4802_v13 = vpop.f32.mrb[2].mxu1 }
 0x1c6   : > { %v1712_v14 = vpop.f32.mrb[3].mxu1 }
 0x1c9   : > { %v4805_v16 = vpop.f32.mrb[4].mxu1 }
 0x1ca   : > { %v1722_v17 = vpop.f32.mrb[5].mxu1 }
 0x1cd   : > { %v4808_v18 = vpop.f32.mrb[6].mxu1 }
 0x1ce   : > { %v1732_v19 = vpop.f32.mrb[7].mxu1 }
 0x1d1   : > { %v4811_v20 = vpop.f32.mrb[8].mxu1 }
 0x1d2   : > { %v1742_v22 = vpop.f32.mrb[9].mxu1 }
 0x1d5   : > { %v6434_v23 = vpop.f32.mrb[10].mxu1 }
 0x1d6   : > { %v6436_v25 = vpop.f32.mrb[11].mxu1 }
 0x1d9   : > { %v6438_v26 = vpop.f32.mrb[12].mxu1 }
 0x1da   : > { %v6440_v27 = vpop.f32.mrb[13].mxu1 }
 0x1dd   : > { %v6442_v28 = vpop.f32.mrb[14].mxu1 }
 0x1de   : > { %v6444_v29 = vpop.f32.mrb[15].mxu1 }
 0x1e5   : > { %v5049_v30 = vpop.f32.mrb[0].mxu0 }
 0x1e6   : > { %v5097_v31 = vadd.f32 %v5049_v30, %v4799_v9  ;;  %v3653_v33 = vpop.f32.mrb[1].mxu0 }
 0x1e7   : > { %v5098_v35 = vadd.f32 %v3653_v33, %v1702_v12 }
 0x1e8   : > { %vm3845_vm3 = vcmp.gt.f32.partialorder %v5097_v31, 0.0  ;;  %v3877_v36 = vmul.f32 0.1, %v5097_v31 }
 0x1e9   : > { %vm3844_vm5 = vcmp.gt.f32.partialorder %v5098_v35, 0.0  ;;  %v3876_v38 = vmul.f32 0.1, %v5098_v35  ;;  %v5052_v40 = vpop.f32.mrb[2].mxu0 }
 0x1ea   : > { %v3909_v4 = vsel %vm3845_vm3, %v5097_v31, %v3877_v36  ;;  %v5099_v42 = vadd.f32 %v5052_v40, %v4802_v13  ;;  %v3663_v43 = vpop.f32.mrb[3].mxu0 }
 0x1eb   : > { %3942 = vst.msk [vmem:[%s6451_s21 + $0x8] sm:$0xff] %vm3940_vm4, %v3909_v4  ;;  %v3908_v10 = vsel %vm3844_vm5, %v5098_v35, %v3876_v38  ;;  %v5100_v44 = vadd.f32 %v3663_v43, %v1712_v14 }
 0x1ec   : > { %3941 = vst.msk [vmem:[%s6451_s21] sm:$0xff] %vm3940_vm4, %v3908_v10  ;;  %vm3847_vm6 = vcmp.gt.f32.partialorder %v5099_v42, 0.0  ;;  %v3879_v45 = vmul.f32 0.1, %v5099_v42 }
 0x1ed   : > { %vm3846_vm7 = vcmp.gt.f32.partialorder %v5100_v44, 0.0  ;;  %v3878_v46 = vmul.f32 0.1, %v5100_v44  ;;  %v5055_v47 = vpop.f32.mrb[4].mxu0 }
 0x1ee   : > { %v3911_v48 = vsel %vm3847_vm6, %v5099_v42, %v3879_v45  ;;  %v5101_v49 = vadd.f32 %v5055_v47, %v4805_v16  ;;  %v3673_v5 = vpop.f32.mrb[5].mxu0 }
 0x1ef   : > { %3944 = vst.msk [vmem:[%s6451_s21 + $0x18] sm:$0xff] %vm3940_vm4, %v3911_v48  ;;  %v3910_v51 = vsel %vm3846_vm7, %v5100_v44, %v3878_v46  ;;  %v5102_v32 = vadd.f32 %v3673_v5, %v1722_v17 }
 0x1f0   : > { %3943 = vst.msk [vmem:[%s6451_s21 + $0x10] sm:$0xff] %vm3940_vm4, %v3910_v51  ;;  %vm3849_vm8 = vcmp.gt.f32.partialorder %v5101_v49, 0.0  ;;  %v3881_v34 = vmul.f32 0.1, %v5101_v49 }
 0x1f1   : > { %vm3848_vm9 = vcmp.gt.f32.partialorder %v5102_v32, 0.0  ;;  %v3880_v7 = vmul.f32 0.1, %v5102_v32  ;;  %v5058_v62 = vpop.f32.mrb[6].mxu0 }
 0x1f2   : > { %v3913_v0 = vsel %vm3849_vm8, %v5101_v49, %v3881_v34  ;;  %v5103_v21 = vadd.f32 %v5058_v62, %v4808_v18  ;;  %v3683_v6 = vpop.f32.mrb[7].mxu0 }
 0x1f3   : > { %3946 = vst.msk [vmem:[%s6451_s21 + $0x28] sm:$0xff] %vm3940_vm4, %v3913_v0  ;;  %v3912_v54 = vsel %vm3848_vm9, %v5102_v32, %v3880_v7  ;;  %v5104_v56 = vadd.f32 %v3683_v6, %v1732_v19 }
 0x1f4   : > { %3945 = vst.msk [vmem:[%s6451_s21 + $0x20] sm:$0xff] %vm3940_vm4, %v3912_v54  ;;  %vm3851_vm10 = vcmp.gt.f32.partialorder %v5103_v21, 0.0  ;;  %v3883_v58 = vmul.f32 0.1, %v5103_v21 }
 0x1f5   : > { %vm3850_vm11 = vcmp.gt.f32.partialorder %v5104_v56, 0.0  ;;  %v3882_v8 = vmul.f32 0.1, %v5104_v56  ;;  %v5061_v2 = vpop.f32.mrb[8].mxu0 }
 0x1f6   : > { %v3915_v24 = vsel %vm3851_vm10, %v5103_v21, %v3883_v58  ;;  %v5105_v41 = vadd.f32 %v5061_v2, %v4811_v20  ;;  %v3693_v52 = vpop.f32.mrb[9].mxu0 }
 0x1f7   : > { %3948 = vst.msk [vmem:[%s6451_s21 + $0x38] sm:$0xff] %vm3940_vm4, %v3915_v24  ;;  %v3914_v55 = vsel %vm3850_vm11, %v5104_v56, %v3882_v8  ;;  %v5106_v59 = vadd.f32 %v3693_v52, %v1742_v22 }
 0x1f8   : > { %3947 = vst.msk [vmem:[%s6451_s21 + $0x30] sm:$0xff] %vm3940_vm4, %v3914_v55  ;;  %vm3853_vm12 = vcmp.gt.f32.partialorder %v5105_v41, 0.0  ;;  %v3885_v39 = vmul.f32 0.1, %v5105_v41 }
 0x1f9   : > { %vm3852_vm13 = vcmp.gt.f32.partialorder %v5106_v59, 0.0  ;;  %v3884_v11 = vmul.f32 0.1, %v5106_v59  ;;  %v5064_v37 = vpop.f32.mrb[10].mxu0 }
 0x1fa   : > { %v3917_v50 = vsel %vm3853_vm12, %v5105_v41, %v3885_v39  ;;  %v5107_v53 = vadd.f32 %v5064_v37, %v6434_v23  ;;  %v3703_v15 = vpop.f32.mrb[11].mxu0 }
 0x1fb   : > { %3950 = vst.msk [vmem:[%s6451_s21 + $0x48] sm:$0xff] %vm3940_vm4, %v3917_v50  ;;  %v3916_v57 = vsel %vm3852_vm13, %v5106_v59, %v3884_v11  ;;  %v5108_v60 = vadd.f32 %v3703_v15, %v6436_v25 }
 0x1fc   : > { %3949 = vst.msk [vmem:[%s6451_s21 + $0x40] sm:$0xff] %vm3940_vm4, %v3916_v57  ;;  %vm3855_vm14 = vcmp.gt.f32.partialorder %v5107_v53, 0.0  ;;  %v3887_v61 = vmul.f32 0.1, %v5107_v53 }
 0x1fd   : > { %vm3854_vm15 = vcmp.gt.f32.partialorder %v5108_v60, 0.0  ;;  %v3886_v63 = vmul.f32 0.1, %v5108_v60  ;;  %v5067_v1 = vpop.f32.mrb[12].mxu0 }
 0x1fe   : > { %v3919_v3 = vsel %vm3855_vm14, %v5107_v53, %v3887_v61  ;;  %v5109_v9 = vadd.f32 %v5067_v1, %v6438_v26  ;;  %v3713_v12 = vpop.f32.mrb[13].mxu0 }
 0x1ff   : > { %3952 = vst.msk [vmem:[%s6451_s21 + $0x58] sm:$0xff] %vm3940_vm4, %v3919_v3  ;;  %v3918_v13 = vsel %vm3854_vm15, %v5108_v60, %v3886_v63  ;;  %v5110_v14 = vadd.f32 %v3713_v12, %v6440_v27 }
 0x200   : > { %3951 = vst.msk [vmem:[%s6451_s21 + $0x50] sm:$0xff] %vm3940_vm4, %v3918_v13  ;;  %vm3857_vm0 = vcmp.gt.f32.partialorder %v5109_v9, 0.0  ;;  %v3889_v16 = vmul.f32 0.1, %v5109_v9 }
 0x201   : > { %vm3856_vm1 = vcmp.gt.f32.partialorder %v5110_v14, 0.0  ;;  %v3888_v17 = vmul.f32 0.1, %v5110_v14  ;;  %v4873_v18 = vpop.f32.mrb[16].mxu1  ;;  %v5070_v19 = vpop.f32.mrb[14].mxu0 }
 0x202   : > { %v3921_v20 = vsel %vm3857_vm0, %v5109_v9, %v3889_v16  ;;  %v5111_v22 = vadd.f32 %v5070_v19, %v6442_v28  ;;  %v2172_v23 = vpop.f32.mrb[17].mxu1  ;;  %v3723_v25 = vpop.f32.mrb[15].mxu0 }
 0x203   : > { %3954 = vst.msk [vmem:[%s6451_s21 + $0x68] sm:$0xff] %vm3940_vm4, %v3921_v20  ;;  %v3920_v26 = vsel %vm3856_vm1, %v5110_v14, %v3888_v17  ;;  %v5112_v27 = vadd.f32 %v3723_v25, %v6444_v29 }
 0x204   : > { %3953 = vst.msk [vmem:[%s6451_s21 + $0x60] sm:$0xff] %vm3940_vm4, %v3920_v26  ;;  %vm3859_vm2 = vcmp.gt.f32.partialorder %v5111_v22, 0.0  ;;  %v3891_v30 = vmul.f32 0.1, %v5111_v22 }
 0x205   : > { %vm3858_vm3 = vcmp.gt.f32.partialorder %v5112_v27, 0.0  ;;  %v3890_v31 = vmul.f32 0.1, %v5112_v27  ;;  %v4876_v33 = vpop.f32.mrb[18].mxu1  ;;  %v5073_v35 = vpop.f32.mrb[16].mxu0 }
 0x206   : > { %v3923_v36 = vsel %vm3859_vm2, %v5111_v22, %v3891_v30  ;;  %v5113_v38 = vadd.f32 %v5073_v35, %v4873_v18  ;;  %v2182_v28 = vpop.f32.mrb[19].mxu1  ;;  %v3733_v40 = vpop.f32.mrb[17].mxu0 }
 0x207   : > { %3956 = vst.msk [vmem:[%s6451_s21 + $0x78] sm:$0xff] %vm3940_vm4, %v3923_v36  ;;  %v3922_v4 = vsel %vm3858_vm3, %v5112_v27, %v3890_v31  ;;  %v5114_v42 = vadd.f32 %v3733_v40, %v2172_v23 }
 0x208   : > { %3955 = vst.msk [vmem:[%s6451_s21 + $0x70] sm:$0xff] %vm3940_vm4, %v3922_v4  ;;  %vm3861_vm5 = vcmp.gt.f32.partialorder %v5113_v38, 0.0  ;;  %v3893_v29 = vmul.f32 0.1, %v5113_v38 }
 0x209   : > { %vm3860_vm6 = vcmp.gt.f32.partialorder %v5114_v42, 0.0  ;;  %v3892_v43 = vmul.f32 0.1, %v5114_v42  ;;  %v4879_v10 = vpop.f32.mrb[20].mxu1  ;;  %v5076_v44 = vpop.f32.mrb[18].mxu0 }
 0x20a   : > { %v3925_v45 = vsel %vm3861_vm5, %v5113_v38, %v3893_v29  ;;  %v5115_v46 = vadd.f32 %v5076_v44, %v4876_v33  ;;  %v2192_v47 = vpop.f32.mrb[21].mxu1  ;;  %v3743_v48 = vpop.f32.mrb[19].mxu0 }
 0x20b   : > { %3958 = vst.msk [vmem:[%s6451_s21 + $0x88] sm:$0xff] %vm3940_vm4, %v3925_v45  ;;  %v3924_v49 = vsel %vm3860_vm6, %v5114_v42, %v3892_v43  ;;  %v5116_v5 = vadd.f32 %v3743_v48, %v2182_v28 }
 0x20c   : > { %3957 = vst.msk [vmem:[%s6451_s21 + $0x80] sm:$0xff] %vm3940_vm4, %v3924_v49  ;;  %vm3863_vm7 = vcmp.gt.f32.partialorder %v5115_v46, 0.0  ;;  %v3895_v51 = vmul.f32 0.1, %v5115_v46 }
 0x20d   : > { %vm3862_vm8 = vcmp.gt.f32.partialorder %v5116_v5, 0.0  ;;  %v3894_v32 = vmul.f32 0.1, %v5116_v5  ;;  %v4882_v34 = vpop.f32.mrb[22].mxu1  ;;  %v5079_v7 = vpop.f32.mrb[20].mxu0 }
 0x20e   : > { %v3927_v62 = vsel %vm3863_vm7, %v5115_v46, %v3895_v51  ;;  %v5117_v0 = vadd.f32 %v5079_v7, %v4879_v10  ;;  %v2202_v21 = vpop.f32.mrb[23].mxu1  ;;  %v3753_v6 = vpop.f32.mrb[21].mxu0 }
 0x20f   : > { %3960 = vst.msk [vmem:[%s6451_s21 + $0x98] sm:$0xff] %vm3940_vm4, %v3927_v62  ;;  %v3926_v54 = vsel %vm3862_vm8, %v5116_v5, %v3894_v32  ;;  %v5118_v56 = vadd.f32 %v3753_v6, %v2192_v47 }
 0x210   : > { %3959 = vst.msk [vmem:[%s6451_s21 + $0x90] sm:$0xff] %vm3940_vm4, %v3926_v54  ;;  %vm3865_vm9 = vcmp.gt.f32.partialorder %v5117_v0, 0.0  ;;  %v3897_v58 = vmul.f32 0.1, %v5117_v0 }
 0x211   : > { %vm3864_vm10 = vcmp.gt.f32.partialorder %v5118_v56, 0.0  ;;  %v3896_v8 = vmul.f32 0.1, %v5118_v56  ;;  %v4885_v2 = vpop.f32.mrb[24].mxu1  ;;  %v5082_v24 = vpop.f32.mrb[22].mxu0 }
 0x212   : > { %v3929_v41 = vsel %vm3865_vm9, %v5117_v0, %v3897_v58  ;;  %v5119_v52 = vadd.f32 %v5082_v24, %v4882_v34  ;;  %v2212_v55 = vpop.f32.mrb[25].mxu1  ;;  %v3763_v59 = vpop.f32.mrb[23].mxu0 }
 0x213   : > { %3962 = vst.msk [vmem:[%s6451_s21 + $0xa8] sm:$0xff] %vm3940_vm4, %v3929_v41  ;;  %v3928_v39 = vsel %vm3864_vm10, %v5118_v56, %v3896_v8  ;;  %v5120_v11 = vadd.f32 %v3763_v59, %v2202_v21 }
 0x214   : > { %3961 = vst.msk [vmem:[%s6451_s21 + $0xa0] sm:$0xff] %vm3940_vm4, %v3928_v39  ;;  %vm3867_vm11 = vcmp.gt.f32.partialorder %v5119_v52, 0.0  ;;  %v3899_v37 = vmul.f32 0.1, %v5119_v52 }
 0x215   : > { %vm3866_vm12 = vcmp.gt.f32.partialorder %v5120_v11, 0.0  ;;  %v3898_v50 = vmul.f32 0.1, %v5120_v11  ;;  %v4888_v53 = vpop.f32.mrb[26].mxu1  ;;  %v5085_v15 = vpop.f32.mrb[24].mxu0 }
 0x216   : > { %v3931_v57 = vsel %vm3867_vm11, %v5119_v52, %v3899_v37  ;;  %v5121_v60 = vadd.f32 %v5085_v15, %v4885_v2  ;;  %v2222_v61 = vpop.f32.mrb[27].mxu1  ;;  %v3773_v63 = vpop.f32.mrb[25].mxu0 }
 0x217   : > { %3964 = vst.msk [vmem:[%s6451_s21 + $0xb8] sm:$0xff] %vm3940_vm4, %v3931_v57  ;;  %v3930_v1 = vsel %vm3866_vm12, %v5120_v11, %v3898_v50  ;;  %v5122_v3 = vadd.f32 %v3773_v63, %v2212_v55 }
 0x218   : > { %3963 = vst.msk [vmem:[%s6451_s21 + $0xb0] sm:$0xff] %vm3940_vm4, %v3930_v1  ;;  %vm3869_vm13 = vcmp.gt.f32.partialorder %v5121_v60, 0.0  ;;  %v3901_v9 = vmul.f32 0.1, %v5121_v60 }
 0x219   : > { %vm3868_vm14 = vcmp.gt.f32.partialorder %v5122_v3, 0.0  ;;  %v3900_v12 = vmul.f32 0.1, %v5122_v3  ;;  %v4891_v13 = vpop.f32.mrb[28].mxu1  ;;  %v5088_v14 = vpop.f32.mrb[26].mxu0 }
 0x21a   : > { %v3933_v16 = vsel %vm3869_vm13, %v5121_v60, %v3901_v9  ;;  %v5123_v17 = vadd.f32 %v5088_v14, %v4888_v53  ;;  %v2232_v18 = vpop.f32.mrb[29].mxu1  ;;  %v3783_v19 = vpop.f32.mrb[27].mxu0 }
 0x21b   : > { %3966 = vst.msk [vmem:[%s6451_s21 + $0xc8] sm:$0xff] %vm3940_vm4, %v3933_v16  ;;  %v3932_v20 = vsel %vm3868_vm14, %v5122_v3, %v3900_v12  ;;  %v5124_v22 = vadd.f32 %v3783_v19, %v2222_v61 }
 0x21c   : > { %3965 = vst.msk [vmem:[%s6451_s21 + $0xc0] sm:$0xff] %vm3940_vm4, %v3932_v20  ;;  %vm3871_vm15 = vcmp.gt.f32.partialorder %v5123_v17, 0.0  ;;  %v3903_v23 = vmul.f32 0.1, %v5123_v17 }
 0x21d   : > { %vm3870_vm0 = vcmp.gt.f32.partialorder %v5124_v22, 0.0  ;;  %v3902_v25 = vmul.f32 0.1, %v5124_v22  ;;  %v4894_v26 = vpop.f32.mrb[30].mxu1  ;;  %v5091_v27 = vpop.f32.mrb[28].mxu0 }
 0x21e   : > { %v3935_v30 = vsel %vm3871_vm15, %v5123_v17, %v3903_v23  ;;  %v5125_v31 = vadd.f32 %v5091_v27, %v4891_v13  ;;  %v2242_v33 = vpop.f32.mrb[31].mxu1  ;;  %v3793_v35 = vpop.f32.mrb[29].mxu0 }
 0x21f   : > { %3968 = vst.msk [vmem:[%s6451_s21 + $0xd8] sm:$0xff] %vm3940_vm4, %v3935_v30  ;;  %v3934_v36 = vsel %vm3870_vm0, %v5124_v22, %v3902_v25  ;;  %v5126_v38 = vadd.f32 %v3793_v35, %v2232_v18 }
 0x220   : > { %3967 = vst.msk [vmem:[%s6451_s21 + $0xd0] sm:$0xff] %vm3940_vm4, %v3934_v36  ;;  %vm3873_vm1 = vcmp.gt.f32.partialorder %v5125_v31, 0.0  ;;  %v3905_v28 = vmul.f32 0.1, %v5125_v31 }
 0x221   : > { %vm3872_vm2 = vcmp.gt.f32.partialorder %v5126_v38, 0.0  ;;  %v3904_v40 = vmul.f32 0.1, %v5126_v38  ;;  %v5094_v4 = vpop.f32.mrb[30].mxu0 }
 0x222   : > { %v3937_v42 = vsel %vm3873_vm1, %v5125_v31, %v3905_v28  ;;  %v5127_v29 = vadd.f32 %v5094_v4, %v4894_v26  ;;  %v3803_v43 = vpop.f32.mrb[31].mxu0 }
 0x223   : > { %3970 = vst.msk [vmem:[%s6451_s21 + $0xe8] sm:$0xff] %vm3940_vm4, %v3937_v42  ;;  %v3936_v10 = vsel %vm3872_vm2, %v5126_v38, %v3904_v40  ;;  %v5128_v44 = vadd.f32 %v3803_v43, %v2242_v33 }
 0x224   : > { %3969 = vst.msk [vmem:[%s6451_s21 + $0xe0] sm:$0xff] %vm3940_vm4, %v3936_v10  ;;  %vm3875_vm3 = vcmp.gt.f32.partialorder %v5127_v29, 0.0  ;;  %v3907_v45 = vmul.f32 0.1, %v5127_v29 }
 0x225   : > { %vm3874_vm5 = vcmp.gt.f32.partialorder %v5128_v44, 0.0  ;;  %v3906_v46 = vmul.f32 0.1, %v5128_v44 }
 0x226   : > { %v3939_v47 = vsel %vm3875_vm3, %v5127_v29, %v3907_v45 }
 0x227   : > { %3972 = vst.msk [vmem:[%s6451_s21 + $0xf8] sm:$0xff] %vm3940_vm4, %v3939_v47  ;;  %v3938_v48 = vsel %vm3874_vm5, %v5128_v44, %v3906_v46 }
 0x228   : > { %3971 = vst.msk [vmem:[%s6451_s21 + $0xf0] sm:$0xff] %vm3940_vm4, %v3938_v48 }
 0x229 PF: > { %s14_s15 = sadd.s32 1, %s5368_s15  }
 0x22a   : > { %p11_p4 = scmp.ge.s32.totalorder %s14_s15, 4  }
 0x22c   :  { %13 = sbr.rel (!%p11_p4) target bundleno = 1 (0x1), region = 76 }

</bundles_post_ra>
